<compile_context>
chip_gen: v7x
topology: tpu7x:2x2x1
jax: 0.10.0
libtpu: 0.0.40
codegen_flags: <defaults>
</compile_context>

<pallas_src>
import math
import functools

import jax
import jax.numpy as jnp
from jax.experimental import pallas as pl
from jax.experimental.pallas import tpu as pltpu

CONFIG = {"only_relations": False}


# ----------------------------- fused Pallas kernel ------------------------- #

def _fused_kernel(idx_ref,                       # scalar prefetch: (B,) int32 in SMEM
                  src_ref, bias_ref, act_ref,    # blocked activations
                  wqkv_ref, bqkv_ref, wo_ref, bo_ref,
                  ln1g_ref, ln1b_ref, w1_ref, b1_ref, w2_ref, b2_ref,
                  ln2g_ref, ln2b_ref,
                  o_ref,                         # (b_blk, 1, K_pad) f32
                  attn_scr, x2_scr,              # VMEM scratch (b_blk*L, H) f32
                  *, n_heads, scale):
    b_blk, L, hid = src_ref.shape
    dh = hid // n_heads
    R = b_blk * L

    x = src_ref[...].reshape(R, hid)             # (R, H) f32

    def layernorm(y, g, b):
        mu = jnp.mean(y, axis=-1, keepdims=True)
        c = y - mu
        var = jnp.mean(c * c, axis=-1, keepdims=True)      # two-pass: robust in f32
        return c * jax.lax.rsqrt(var + 1e-5) * g + b

    # ---- fused QKV projection: one MXU pass over all b_blk*L rows ----
    qkv = jnp.dot(x.astype(jnp.bfloat16), wqkv_ref[...],
                  preferred_element_type=jnp.float32) + bqkv_ref[...]   # (R, 3H)
    q = qkv[:, :hid] * scale                     # pre-scaled once, not per head
    k = qkv[:, hid:2 * hid]
    v = qkv[:, 2 * hid:]

    bias = bias_ref[...]                         # (b_blk, 1, L): 0 keep / -1e10 pad

    # ---- per-example multi-head attention; head outputs -> VMEM scratch ----
    for b in range(b_blk):
        rows = slice(b * L, (b + 1) * L)
        bias_b = bias[b]                         # (1, L), broadcast over query rows
        for h in range(n_heads):
            cols = slice(h * dh, (h + 1) * dh)
            qh, kh, vh = q[rows, cols], k[rows, cols], v[rows, cols]
            # contraction on the feature dim -> no explicit transpose of K
            s = jax.lax.dot_general(qh, kh, (((1,), (1,)), ((), ())),
                                    preferred_element_type=jnp.float32)  # (L, L)
            s = s + bias_b
            s = s - jnp.max(s, axis=-1, keepdims=True)
            p = jnp.exp(s)
            denom = jnp.sum(p, axis=-1, keepdims=True)                   # (L, 1)
            oh = jnp.dot(p, vh, preferred_element_type=jnp.float32)      # (L, dh)
            # normalize after the P.V matmul (L x dh, not L x L)
            attn_scr[rows, cols] = oh * pl.reciprocal(denom, approx=True)

    attn = attn_scr[...]                                                 # (R, H)

    # ---- output projection + residual + LayerNorm ----
    a = jnp.dot(attn.astype(jnp.bfloat16), wo_ref[...],
                preferred_element_type=jnp.float32) + bo_ref[...]
    x1 = layernorm(a + x, ln1g_ref[...], ln1b_ref[...])

    # ---- position-wise FFN + residual + LayerNorm ----
    f = jnp.dot(x1.astype(jnp.bfloat16), w1_ref[...],
                preferred_element_type=jnp.float32) + b1_ref[...]
    f = jnp.maximum(f, 0.0)
    f = jnp.dot(f.astype(jnp.bfloat16), w2_ref[...],
                preferred_element_type=jnp.float32) + b2_ref[...]
    x2_scr[...] = layernorm(f + x1, ln2g_ref[...], ln2b_ref[...])        # (R, H)

    # ---- fused score epilogue: gather last-token row, score on the MXU ----
    base = pl.program_id(0) * b_blk
    for b in range(b_blk):
        idx = idx_ref[base + b]                                          # SMEM scalar
        row = x2_scr[pl.ds(b * L + idx, 1), :]                           # (1, H)
        o_ref[b] = jax.lax.dot_general(                                  # (1, K_pad)
            row, act_ref[b], (((1,), (1,)), ((), ())),
            preferred_element_type=jnp.float32)


def _resident_spec(arr):
    """Full-array block, constant index -> weight stays VMEM-resident across grid."""
    zeros = (0,) * arr.ndim
    return pl.BlockSpec(arr.shape, lambda i, _idx, _z=zeros: _z)


def _pick_b_blk(batch, seq_len, target_rows=256):
    """Largest batch block with b_blk*L <= target rows, keeping >= 2 grid steps."""
    divs = [d for d in range(1, batch + 1)
            if batch % d == 0 and d * seq_len <= target_rows]
    if not divs:
        return 1
    two_step = [d for d in divs if batch // d >= 2]   # keep both v7x TCs busy
    return max(two_step) if two_step else max(divs)


def fused_encoder_score(src, attn_bias, act_sel, idxs, params, n_heads):
    """src: (B,L,H) f32, attn_bias: (B,1,L) f32, act_sel: (B,K_pad,H) f32,
    idxs: (B,) int32 -> (B, K_pad) f32 scores."""
    B, L, hid = src.shape
    K_pad = act_sel.shape[1]
    scale = 1.0 / math.sqrt(hid // n_heads)
    b_blk = _pick_b_blk(B, L)

    bf = lambda w: w.astype(jnp.bfloat16)              # MXU operands in bf16
    row = lambda v: v.reshape(1, -1).astype(jnp.float32)

    weights = (
        bf(params["wqkv"]), row(params["bqkv"]),
        bf(params["wo"]), row(params["bo"]),
        row(params["ln1_g"]), row(params["ln1_b"]),
        bf(params["w1"]), row(params["b1"]),
        bf(params["w2"]), row(params["b2"]),
        row(params["ln2_g"]), row(params["ln2_b"]),
    )

    grid_spec = pltpu.PrefetchScalarGridSpec(
        num_scalar_prefetch=1,
        grid=(B // b_blk,),
        in_specs=[
            pl.BlockSpec((b_blk, L, hid), lambda i, _idx: (i, 0, 0)),      # src
            pl.BlockSpec((b_blk, 1, L), lambda i, _idx: (i, 0, 0)),        # mask bias
            pl.BlockSpec((b_blk, K_pad, hid), lambda i, _idx: (i, 0, 0)),  # actions
        ] + [_resident_spec(w) for w in weights],
        out_specs=pl.BlockSpec((b_blk, 1, K_pad), lambda i, _idx: (i, 0, 0)),
        scratch_shapes=[pltpu.VMEM((b_blk * L, hid), jnp.float32),   # attn heads
                        pltpu.VMEM((b_blk * L, hid), jnp.float32)],  # encoded rows
    )

    out = pl.pallas_call(
        functools.partial(_fused_kernel, n_heads=n_heads, scale=scale),
        out_shape=jax.ShapeDtypeStruct((B, 1, K_pad), jnp.float32),
        grid_spec=grid_spec,
        compiler_params=pltpu.CompilerParams(
            dimension_semantics=("parallel",),
            vmem_limit_bytes=32 * 1024 * 1024),
    )(idxs, src, attn_bias, act_sel, *weights)
    return out[:, 0, :]                                               # (B, K_pad)


# ------------------------------ parameters -------------------------------- #

def init_params(key, entity_vocab, relation_vocab, hid_dim, pf_dim, max_len):
    def nrm(k, shape, s=0.02):
        return s * jax.random.normal(k, shape, dtype=jnp.float32)

    keys = jax.random.split(key, 10)
    half = hid_dim // 2
    return {
        # encoder-internal embeddings (the injected `encoder` sub-module)
        "enc_ent_emb": nrm(keys[0], (entity_vocab, half)),
        "enc_rel_emb": nrm(keys[1], (relation_vocab, half)),
        "pos_emb": nrm(keys[2], (max_len, hid_dim)),
        # multi-head attention (Q|K|V fused)
        "wqkv": nrm(keys[3], (hid_dim, 3 * hid_dim)),
        "bqkv": jnp.zeros((3 * hid_dim,), jnp.float32),
        "wo": nrm(keys[4], (hid_dim, hid_dim)), "bo": jnp.zeros((hid_dim,), jnp.float32),
        "ln1_g": jnp.ones((hid_dim,), jnp.float32), "ln1_b": jnp.zeros((hid_dim,), jnp.float32),
        # position-wise feedforward
        "w1": nrm(keys[5], (hid_dim, pf_dim)), "b1": jnp.zeros((pf_dim,), jnp.float32),
        "w2": nrm(keys[6], (pf_dim, hid_dim)), "b2": jnp.zeros((hid_dim,), jnp.float32),
        "ln2_g": jnp.ones((hid_dim,), jnp.float32), "ln2_b": jnp.zeros((hid_dim,), jnp.float32),
        # Transformer-module action embeddings (only_relations == False path)
        "act_ent_emb": nrm(keys[7], (entity_vocab, half)),
        "act_rel_emb": nrm(keys[8], (relation_vocab, half)),
    }


# ------------------------------- forward ----------------------------------- #

def transformer_forward(params, entities, relations, actions_r, actions_e,
                        action_keys, entity_pad_idx=0, n_heads=4):
    B, L = entities.shape
    hid = params["pos_emb"].shape[1]

    # make_mask: (entities != pad).view(B,1,1,L) -> additive bias (B,1,L), hoisted
    mask = entities != entity_pad_idx
    attn_bias = jnp.where(mask, 0.0, -1e10).astype(jnp.float32).reshape(B, 1, L)

    # encoder token + positional embedding (table gathers are glue -> plain JAX)
    tok = jnp.concatenate(
        [jnp.take(params["enc_ent_emb"], entities, axis=0),
         jnp.take(params["enc_rel_emb"], relations, axis=0)], axis=-1)        # (B, L, H)
    src = (tok * math.sqrt(hid) + params["pos_emb"][:L][None]).astype(jnp.float32)

    # idxs = mask.sum([1,2,3]) - 1 -> index of last non-pad token per example.
    # TODO(synk): clamp diverges from PyTorch only for a fully-padded row (-1 -> L-1).
    idxs = jnp.maximum(jnp.sum(mask, axis=-1).astype(jnp.int32) - 1, 0)       # (B,)

    # action_embedding = cat([relation_embedding(r), entity_embedding(e)], -1)
    act_emb = jnp.concatenate(
        [jnp.take(params["act_rel_emb"], actions_r, axis=0),
         jnp.take(params["act_ent_emb"], actions_e, axis=0)], axis=-1)        # (A, H)
    act_sel = jnp.take(act_emb, action_keys, axis=0)                          # (B, K, H)

    # pad K toward a lane-dense multiple of 128 for the fused score output
    K = act_sel.shape[1]
    K_pad = ((K + 127) // 128) * 128
    act_sel_p = jnp.pad(act_sel, ((0, 0), (0, K_pad - K), (0, 0)))

    # preds[i] = action_embedding[keys_i] @ encoded[i]  (fixed K per batch -> (B, K))
    preds = fused_encoder_score(src, attn_bias, act_sel_p, idxs, params, n_heads)
    return preds[:, :K]


# -------------------------------- main ------------------------------------- #

if __name__ == "__main__":
    B, L, HID, HEADS, PF = 2, 8, 128, 4, 256
    ENTITY_VOCAB, RELATION_VOCAB = 10, 12
    A, K = 6, 5
    ENTITY_PAD_IDX = 0

    key = jax.random.PRNGKey(0)
    pkey, k1, k2, k3, k4 = jax.random.split(key, 5)
    params = init_params(pkey, ENTITY_VOCAB, RELATION_VOCAB, HID, PF, max_len=L)

    # padding (id 0) at the end of the sequence, as the last-token gather assumes
    entities = jnp.array([[3, 5, 2, 7, 1, 4, 0, 0],
                          [2, 2, 9, 4, 6, 1, 8, 3]], dtype=jnp.int32)         # (B, L)
    relations = jax.random.randint(k1, (B, L), 1, RELATION_VOCAB, dtype=jnp.int32)
    actions_r = jax.random.randint(k2, (A,), 0, RELATION_VOCAB, dtype=jnp.int32)
    actions_e = jax.random.randint(k3, (A,), 0, ENTITY_VOCAB, dtype=jnp.int32)
    action_keys = jax.random.randint(k4, (B, K), 0, A, dtype=jnp.int32)

    preds = transformer_forward(params, entities, relations, actions_r, actions_e,
                                action_keys, entity_pad_idx=ENTITY_PAD_IDX, n_heads=HEADS)
    jax.block_until_ready(preds)
    assert preds.shape == (B, K) and preds.dtype == jnp.float32
    assert bool(jnp.all(jnp.isfinite(preds)))
    print("KERNEL_OK")
</pallas_src>

<mosaic_0001>
module attributes {stable_mosaic.version = 11 : i64} {
  func.func @_fused_kernel(%arg0: i32, %arg1: memref<2xi32, #tpu.memory_space<smem>>, %arg2: memref<1x8x128xf32, #tpu.memory_space<vmem>>, %arg3: memref<1x1x8xf32, #tpu.memory_space<vmem>>, %arg4: memref<1x128x128xf32, #tpu.memory_space<vmem>>, %arg5: memref<128x384xbf16, #tpu.memory_space<vmem>>, %arg6: memref<1x384xf32, #tpu.memory_space<vmem>>, %arg7: memref<128x128xbf16, #tpu.memory_space<vmem>>, %arg8: memref<1x128xf32, #tpu.memory_space<vmem>>, %arg9: memref<1x128xf32, #tpu.memory_space<vmem>>, %arg10: memref<1x128xf32, #tpu.memory_space<vmem>>, %arg11: memref<128x256xbf16, #tpu.memory_space<vmem>>, %arg12: memref<1x256xf32, #tpu.memory_space<vmem>>, %arg13: memref<256x128xbf16, #tpu.memory_space<vmem>>, %arg14: memref<1x128xf32, #tpu.memory_space<vmem>>, %arg15: memref<1x128xf32, #tpu.memory_space<vmem>>, %arg16: memref<1x128xf32, #tpu.memory_space<vmem>>, %arg17: memref<1x1x128xf32, #tpu.memory_space<vmem>>, %arg18: memref<8x128xf32, #tpu.memory_space<vmem>>, %arg19: memref<8x128xf32, #tpu.memory_space<vmem>>) attributes {dimension_semantics = [#tpu.dimension_semantics<parallel>], iteration_bounds = array<i64: 2>, scalar_prefetch = 1 : i64, scratch_operands = 2 : i64, tpu.core_type = #tpu.core_type<tc>, window_params = [{transform_indices = @transform_0, window_bounds = array<i64: 1, 8, 128>}, {transform_indices = @transform_1, window_bounds = array<i64: 1, 1, 8>}, {transform_indices = @transform_2, window_bounds = array<i64: 1, 128, 128>}, {pipeline_mode = #tpu.pipeline_mode<synchronous>, transform_indices = @transform_3, window_bounds = array<i64: 128, 384>}, {pipeline_mode = #tpu.pipeline_mode<synchronous>, transform_indices = @transform_4, window_bounds = array<i64: 1, 384>}, {pipeline_mode = #tpu.pipeline_mode<synchronous>, transform_indices = @transform_5, window_bounds = array<i64: 128, 128>}, {pipeline_mode = #tpu.pipeline_mode<synchronous>, transform_indices = @transform_6, window_bounds = array<i64: 1, 128>}, {pipeline_mode = #tpu.pipeline_mode<synchronous>, transform_indices = @transform_7, window_bounds = array<i64: 1, 128>}, {pipeline_mode = #tpu.pipeline_mode<synchronous>, transform_indices = @transform_8, window_bounds = array<i64: 1, 128>}, {pipeline_mode = #tpu.pipeline_mode<synchronous>, transform_indices = @transform_9, window_bounds = array<i64: 128, 256>}, {pipeline_mode = #tpu.pipeline_mode<synchronous>, transform_indices = @transform_10, window_bounds = array<i64: 1, 256>}, {pipeline_mode = #tpu.pipeline_mode<synchronous>, transform_indices = @transform_11, window_bounds = array<i64: 256, 128>}, {pipeline_mode = #tpu.pipeline_mode<synchronous>, transform_indices = @transform_12, window_bounds = array<i64: 1, 128>}, {pipeline_mode = #tpu.pipeline_mode<synchronous>, transform_indices = @transform_13, window_bounds = array<i64: 1, 128>}, {pipeline_mode = #tpu.pipeline_mode<synchronous>, transform_indices = @transform_14, window_bounds = array<i64: 1, 128>}, {transform_indices = @transform_15, window_bounds = array<i64: 1, 1, 128>}]} {
    %c0 = arith.constant 0 : index
    %c0_0 = arith.constant 0 : index
    %c0_1 = arith.constant 0 : index
    %0 = vector.load %arg2[%c0, %c0_0, %c0_1] : memref<1x8x128xf32, #tpu.memory_space<vmem>>, vector<1x8x128xf32>
    %1 = vector.shape_cast %0 : vector<1x8x128xf32> to vector<8x128xf32>
    %2 = arith.truncf %1 : vector<8x128xf32> to vector<8x128xbf16>
    %c0_2 = arith.constant 0 : index
    %c0_3 = arith.constant 0 : index
    %3 = vector.load %arg5[%c0_2, %c0_3] : memref<128x384xbf16, #tpu.memory_space<vmem>>, vector<128x384xbf16>
    %cst = arith.constant dense<0.000000e+00> : vector<8x384xf32>
    %4 = tpu.matmul %2, %3, %cst {dimension_numbers = #tpu.dot_dimension_numbers<[1], [0], [0], [1], [0, 0, 1, 1], [], []>} : vector<8x128xbf16>, vector<128x384xbf16>, vector<8x384xf32> -> vector<8x384xf32>
    %c0_4 = arith.constant 0 : index
    %c0_5 = arith.constant 0 : index
    %5 = vector.load %arg6[%c0_4, %c0_5] : memref<1x384xf32, #tpu.memory_space<vmem>>, vector<1x384xf32>
    %6 = vector.broadcast %5 : vector<1x384xf32> to vector<8x384xf32>
    %7 = arith.addf %4, %6 : vector<8x384xf32>
    %8 = vector.extract_strided_slice %7 {offsets = [0, 0], sizes = [8, 128], strides = [1, 1]} : vector<8x384xf32> to vector<8x128xf32>
    %cst_6 = arith.constant 0.176776692 : f32
    %9 = vector.broadcast %cst_6 : f32 to vector<8x128xf32>
    %10 = arith.mulf %8, %9 : vector<8x128xf32>
    %11 = vector.extract_strided_slice %7 {offsets = [0, 128], sizes = [8, 128], strides = [1, 1]} : vector<8x384xf32> to vector<8x128xf32>
    %12 = vector.extract_strided_slice %7 {offsets = [0, 256], sizes = [8, 128], strides = [1, 1]} : vector<8x384xf32> to vector<8x128xf32>
    %c0_7 = arith.constant 0 : index
    %c0_8 = arith.constant 0 : index
    %c0_9 = arith.constant 0 : index
    %13 = vector.load %arg3[%c0_7, %c0_8, %c0_9] : memref<1x1x8xf32, #tpu.memory_space<vmem>>, vector<1x1x8xf32>
    %14 = vector.shape_cast %13 : vector<1x1x8xf32> to vector<1x8xf32>
    %15 = vector.extract_strided_slice %10 {offsets = [0, 0], sizes = [8, 32], strides = [1, 1]} : vector<8x128xf32> to vector<8x32xf32>
    %16 = vector.extract_strided_slice %11 {offsets = [0, 0], sizes = [8, 32], strides = [1, 1]} : vector<8x128xf32> to vector<8x32xf32>
    %17 = vector.extract_strided_slice %12 {offsets = [0, 0], sizes = [8, 32], strides = [1, 1]} : vector<8x128xf32> to vector<8x32xf32>
    %cst_10 = arith.constant dense<0.000000e+00> : vector<8x8xf32>
    %18 = tpu.matmul %15, %16, %cst_10 {dimension_numbers = #tpu.dot_dimension_numbers<[1], [1], [0], [0], [0, 0, 1, 0], [], []>} : vector<8x32xf32>, vector<8x32xf32>, vector<8x8xf32> -> vector<8x8xf32>
    %19 = vector.broadcast %14 : vector<1x8xf32> to vector<8x8xf32>
    %20 = arith.addf %18, %19 : vector<8x8xf32>
    %cst_11 = arith.constant dense<0xFF800000> : vector<8xf32>
    %21 = vector.multi_reduction <maximumf>, %20, %cst_11 [1] : vector<8x8xf32> to vector<8xf32>
    %22 = vector.shape_cast %21 : vector<8xf32> to vector<8x1xf32>
    %23 = vector.broadcast %22 : vector<8x1xf32> to vector<8x8xf32>
    %24 = arith.subf %20, %23 : vector<8x8xf32>
    %25 = math.exp %24 : vector<8x8xf32>
    %cst_12 = arith.constant dense<0.000000e+00> : vector<8xf32>
    %26 = vector.multi_reduction <add>, %25, %cst_12 [1] : vector<8x8xf32> to vector<8xf32>
    %27 = vector.shape_cast %26 : vector<8xf32> to vector<8x1xf32>
    %cst_13 = arith.constant dense<0.000000e+00> : vector<8x32xf32>
    %28 = tpu.matmul %25, %17, %cst_13 {dimension_numbers = #tpu.dot_dimension_numbers<[1], [0], [0], [1], [0, 0, 1, 1], [], []>} : vector<8x8xf32>, vector<8x32xf32>, vector<8x32xf32> -> vector<8x32xf32>
    %29 = tpu.reciprocal %27 {approx = true} : vector<8x1xf32> -> vector<8x1xf32>
    %30 = vector.broadcast %29 : vector<8x1xf32> to vector<8x32xf32>
    %31 = arith.mulf %28, %30 : vector<8x32xf32>
    %c0_14 = arith.constant 0 : index
    %c0_15 = arith.constant 0 : index
    %32 = vector.load %arg18[%c0_14, %c0_15] : memref<8x128xf32, #tpu.memory_space<vmem>>, vector<8x32xf32>
    tpu.vector_store %arg18[%c0_14, %c0_15], %31 {strides = array<i32>} : memref<8x128xf32, #tpu.memory_space<vmem>>, vector<8x32xf32>,
    %33 = vector.extract_strided_slice %10 {offsets = [0, 32], sizes = [8, 32], strides = [1, 1]} : vector<8x128xf32> to vector<8x32xf32>
    %34 = vector.extract_strided_slice %11 {offsets = [0, 32], sizes = [8, 32], strides = [1, 1]} : vector<8x128xf32> to vector<8x32xf32>
    %35 = vector.extract_strided_slice %12 {offsets = [0, 32], sizes = [8, 32], strides = [1, 1]} : vector<8x128xf32> to vector<8x32xf32>
    %cst_16 = arith.constant dense<0.000000e+00> : vector<8x8xf32>
    %36 = tpu.matmul %33, %34, %cst_16 {dimension_numbers = #tpu.dot_dimension_numbers<[1], [1], [0], [0], [0, 0, 1, 0], [], []>} : vector<8x32xf32>, vector<8x32xf32>, vector<8x8xf32> -> vector<8x8xf32>
    %37 = vector.broadcast %14 : vector<1x8xf32> to vector<8x8xf32>
    %38 = arith.addf %36, %37 : vector<8x8xf32>
    %cst_17 = arith.constant dense<0xFF800000> : vector<8xf32>
    %39 = vector.multi_reduction <maximumf>, %38, %cst_17 [1] : vector<8x8xf32> to vector<8xf32>
    %40 = vector.shape_cast %39 : vector<8xf32> to vector<8x1xf32>
    %41 = vector.broadcast %40 : vector<8x1xf32> to vector<8x8xf32>
    %42 = arith.subf %38, %41 : vector<8x8xf32>
    %43 = math.exp %42 : vector<8x8xf32>
    %cst_18 = arith.constant dense<0.000000e+00> : vector<8xf32>
    %44 = vector.multi_reduction <add>, %43, %cst_18 [1] : vector<8x8xf32> to vector<8xf32>
    %45 = vector.shape_cast %44 : vector<8xf32> to vector<8x1xf32>
    %cst_19 = arith.constant dense<0.000000e+00> : vector<8x32xf32>
    %46 = tpu.matmul %43, %35, %cst_19 {dimension_numbers = #tpu.dot_dimension_numbers<[1], [0], [0], [1], [0, 0, 1, 1], [], []>} : vector<8x8xf32>, vector<8x32xf32>, vector<8x32xf32> -> vector<8x32xf32>
    %47 = tpu.reciprocal %45 {approx = true} : vector<8x1xf32> -> vector<8x1xf32>
    %48 = vector.broadcast %47 : vector<8x1xf32> to vector<8x32xf32>
    %49 = arith.mulf %46, %48 : vector<8x32xf32>
    %c0_20 = arith.constant 0 : index
    %c32 = arith.constant 32 : index
    %50 = vector.load %arg18[%c0_20, %c32] : memref<8x128xf32, #tpu.memory_space<vmem>>, vector<8x32xf32>
    tpu.vector_store %arg18[%c0_20, %c32], %49 {strides = array<i32>} : memref<8x128xf32, #tpu.memory_space<vmem>>, vector<8x32xf32>,
    %51 = vector.extract_strided_slice %10 {offsets = [0, 64], sizes = [8, 32], strides = [1, 1]} : vector<8x128xf32> to vector<8x32xf32>
    %52 = vector.extract_strided_slice %11 {offsets = [0, 64], sizes = [8, 32], strides = [1, 1]} : vector<8x128xf32> to vector<8x32xf32>
    %53 = vector.extract_strided_slice %12 {offsets = [0, 64], sizes = [8, 32], strides = [1, 1]} : vector<8x128xf32> to vector<8x32xf32>
    %cst_21 = arith.constant dense<0.000000e+00> : vector<8x8xf32>
    %54 = tpu.matmul %51, %52, %cst_21 {dimension_numbers = #tpu.dot_dimension_numbers<[1], [1], [0], [0], [0, 0, 1, 0], [], []>} : vector<8x32xf32>, vector<8x32xf32>, vector<8x8xf32> -> vector<8x8xf32>
    %55 = vector.broadcast %14 : vector<1x8xf32> to vector<8x8xf32>
    %56 = arith.addf %54, %55 : vector<8x8xf32>
    %cst_22 = arith.constant dense<0xFF800000> : vector<8xf32>
    %57 = vector.multi_reduction <maximumf>, %56, %cst_22 [1] : vector<8x8xf32> to vector<8xf32>
    %58 = vector.shape_cast %57 : vector<8xf32> to vector<8x1xf32>
    %59 = vector.broadcast %58 : vector<8x1xf32> to vector<8x8xf32>
    %60 = arith.subf %56, %59 : vector<8x8xf32>
    %61 = math.exp %60 : vector<8x8xf32>
    %cst_23 = arith.constant dense<0.000000e+00> : vector<8xf32>
    %62 = vector.multi_reduction <add>, %61, %cst_23 [1] : vector<8x8xf32> to vector<8xf32>
    %63 = vector.shape_cast %62 : vector<8xf32> to vector<8x1xf32>
    %cst_24 = arith.constant dense<0.000000e+00> : vector<8x32xf32>
    %64 = tpu.matmul %61, %53, %cst_24 {dimension_numbers = #tpu.dot_dimension_numbers<[1], [0], [0], [1], [0, 0, 1, 1], [], []>} : vector<8x8xf32>, vector<8x32xf32>, vector<8x32xf32> -> vector<8x32xf32>
    %65 = tpu.reciprocal %63 {approx = true} : vector<8x1xf32> -> vector<8x1xf32>
    %66 = vector.broadcast %65 : vector<8x1xf32> to vector<8x32xf32>
    %67 = arith.mulf %64, %66 : vector<8x32xf32>
    %c0_25 = arith.constant 0 : index
    %c64 = arith.constant 64 : index
    %68 = vector.load %arg18[%c0_25, %c64] : memref<8x128xf32, #tpu.memory_space<vmem>>, vector<8x32xf32>
    tpu.vector_store %arg18[%c0_25, %c64], %67 {strides = array<i32>} : memref<8x128xf32, #tpu.memory_space<vmem>>, vector<8x32xf32>,
    %69 = vector.extract_strided_slice %10 {offsets = [0, 96], sizes = [8, 32], strides = [1, 1]} : vector<8x128xf32> to vector<8x32xf32>
    %70 = vector.extract_strided_slice %11 {offsets = [0, 96], sizes = [8, 32], strides = [1, 1]} : vector<8x128xf32> to vector<8x32xf32>
    %71 = vector.extract_strided_slice %12 {offsets = [0, 96], sizes = [8, 32], strides = [1, 1]} : vector<8x128xf32> to vector<8x32xf32>
    %cst_26 = arith.constant dense<0.000000e+00> : vector<8x8xf32>
    %72 = tpu.matmul %69, %70, %cst_26 {dimension_numbers = #tpu.dot_dimension_numbers<[1], [1], [0], [0], [0, 0, 1, 0], [], []>} : vector<8x32xf32>, vector<8x32xf32>, vector<8x8xf32> -> vector<8x8xf32>
    %73 = vector.broadcast %14 : vector<1x8xf32> to vector<8x8xf32>
    %74 = arith.addf %72, %73 : vector<8x8xf32>
    %cst_27 = arith.constant dense<0xFF800000> : vector<8xf32>
    %75 = vector.multi_reduction <maximumf>, %74, %cst_27 [1] : vector<8x8xf32> to vector<8xf32>
    %76 = vector.shape_cast %75 : vector<8xf32> to vector<8x1xf32>
    %77 = vector.broadcast %76 : vector<8x1xf32> to vector<8x8xf32>
    %78 = arith.subf %74, %77 : vector<8x8xf32>
    %79 = math.exp %78 : vector<8x8xf32>
    %cst_28 = arith.constant dense<0.000000e+00> : vector<8xf32>
    %80 = vector.multi_reduction <add>, %79, %cst_28 [1] : vector<8x8xf32> to vector<8xf32>
    %81 = vector.shape_cast %80 : vector<8xf32> to vector<8x1xf32>
    %cst_29 = arith.constant dense<0.000000e+00> : vector<8x32xf32>
    %82 = tpu.matmul %79, %71, %cst_29 {dimension_numbers = #tpu.dot_dimension_numbers<[1], [0], [0], [1], [0, 0, 1, 1], [], []>} : vector<8x8xf32>, vector<8x32xf32>, vector<8x32xf32> -> vector<8x32xf32>
    %83 = tpu.reciprocal %81 {approx = true} : vector<8x1xf32> -> vector<8x1xf32>
    %84 = vector.broadcast %83 : vector<8x1xf32> to vector<8x32xf32>
    %85 = arith.mulf %82, %84 : vector<8x32xf32>
    %c0_30 = arith.constant 0 : index
    %c96 = arith.constant 96 : index
    %86 = vector.load %arg18[%c0_30, %c96] : memref<8x128xf32, #tpu.memory_space<vmem>>, vector<8x32xf32>
    tpu.vector_store %arg18[%c0_30, %c96], %85 {strides = array<i32>} : memref<8x128xf32, #tpu.memory_space<vmem>>, vector<8x32xf32>,
    %c0_31 = arith.constant 0 : index
    %c0_32 = arith.constant 0 : index
    %87 = vector.load %arg18[%c0_31, %c0_32] : memref<8x128xf32, #tpu.memory_space<vmem>>, vector<8x128xf32>
    %88 = arith.truncf %87 : vector<8x128xf32> to vector<8x128xbf16>
    %c0_33 = arith.constant 0 : index
    %c0_34 = arith.constant 0 : index
    %89 = vector.load %arg7[%c0_33, %c0_34] : memref<128x128xbf16, #tpu.memory_space<vmem>>, vector<128x128xbf16>
    %cst_35 = arith.constant dense<0.000000e+00> : vector<8x128xf32>
    %90 = tpu.matmul %88, %89, %cst_35 {dimension_numbers = #tpu.dot_dimension_numbers<[1], [0], [0], [1], [0, 0, 1, 1], [], []>} : vector<8x128xbf16>, vector<128x128xbf16>, vector<8x128xf32> -> vector<8x128xf32>
    %c0_36 = arith.constant 0 : index
    %c0_37 = arith.constant 0 : index
    %91 = vector.load %arg8[%c0_36, %c0_37] : memref<1x128xf32, #tpu.memory_space<vmem>>, vector<1x128xf32>
    %92 = vector.broadcast %91 : vector<1x128xf32> to vector<8x128xf32>
    %93 = arith.addf %90, %92 : vector<8x128xf32>
    %94 = arith.addf %93, %1 : vector<8x128xf32>
    %c0_38 = arith.constant 0 : index
    %c0_39 = arith.constant 0 : index
    %95 = vector.load %arg9[%c0_38, %c0_39] : memref<1x128xf32, #tpu.memory_space<vmem>>, vector<1x128xf32>
    %c0_40 = arith.constant 0 : index
    %c0_41 = arith.constant 0 : index
    %96 = vector.load %arg10[%c0_40, %c0_41] : memref<1x128xf32, #tpu.memory_space<vmem>>, vector<1x128xf32>
    %cst_42 = arith.constant dense<0.000000e+00> : vector<8xf32>
    %97 = vector.multi_reduction <add>, %94, %cst_42 [1] : vector<8x128xf32> to vector<8xf32>
    %98 = vector.shape_cast %97 : vector<8xf32> to vector<8x1xf32>
    %cst_43 = arith.constant 1.280000e+02 : f32
    %99 = vector.broadcast %cst_43 : f32 to vector<8x1xf32>
    %100 = arith.divf %98, %99 : vector<8x1xf32>
    %101 = vector.broadcast %100 : vector<8x1xf32> to vector<8x128xf32>
    %102 = arith.subf %94, %101 : vector<8x128xf32>
    %103 = arith.mulf %102, %102 : vector<8x128xf32>
    %cst_44 = arith.constant dense<0.000000e+00> : vector<8xf32>
    %104 = vector.multi_reduction <add>, %103, %cst_44 [1] : vector<8x128xf32> to vector<8xf32>
    %105 = vector.shape_cast %104 : vector<8xf32> to vector<8x1xf32>
    %cst_45 = arith.constant 1.280000e+02 : f32
    %106 = vector.broadcast %cst_45 : f32 to vector<8x1xf32>
    %107 = arith.divf %105, %106 : vector<8x1xf32>
    %cst_46 = arith.constant 9.99999974E-6 : f32
    %108 = vector.broadcast %cst_46 : f32 to vector<8x1xf32>
    %109 = arith.addf %107, %108 : vector<8x1xf32>
    %110 = math.rsqrt %109 : vector<8x1xf32>
    %111 = vector.broadcast %110 : vector<8x1xf32> to vector<8x128xf32>
    %112 = arith.mulf %102, %111 : vector<8x128xf32>
    %113 = vector.broadcast %95 : vector<1x128xf32> to vector<8x128xf32>
    %114 = arith.mulf %112, %113 : vector<8x128xf32>
    %115 = vector.broadcast %96 : vector<1x128xf32> to vector<8x128xf32>
    %116 = arith.addf %114, %115 : vector<8x128xf32>
    %117 = arith.truncf %116 : vector<8x128xf32> to vector<8x128xbf16>
    %c0_47 = arith.constant 0 : index
    %c0_48 = arith.constant 0 : index
    %118 = vector.load %arg11[%c0_47, %c0_48] : memref<128x256xbf16, #tpu.memory_space<vmem>>, vector<128x256xbf16>
    %cst_49 = arith.constant dense<0.000000e+00> : vector<8x256xf32>
    %119 = tpu.matmul %117, %118, %cst_49 {dimension_numbers = #tpu.dot_dimension_numbers<[1], [0], [0], [1], [0, 0, 1, 1], [], []>} : vector<8x128xbf16>, vector<128x256xbf16>, vector<8x256xf32> -> vector<8x256xf32>
    %c0_50 = arith.constant 0 : index
    %c0_51 = arith.constant 0 : index
    %120 = vector.load %arg12[%c0_50, %c0_51] : memref<1x256xf32, #tpu.memory_space<vmem>>, vector<1x256xf32>
    %121 = vector.broadcast %120 : vector<1x256xf32> to vector<8x256xf32>
    %122 = arith.addf %119, %121 : vector<8x256xf32>
    %cst_52 = arith.constant 0.000000e+00 : f32
    %123 = vector.broadcast %cst_52 : f32 to vector<8x256xf32>
    %124 = arith.maximumf %122, %123 : vector<8x256xf32>
    %125 = arith.truncf %124 : vector<8x256xf32> to vector<8x256xbf16>
    %c0_53 = arith.constant 0 : index
    %c0_54 = arith.constant 0 : index
    %126 = vector.load %arg13[%c0_53, %c0_54] : memref<256x128xbf16, #tpu.memory_space<vmem>>, vector<256x128xbf16>
    %cst_55 = arith.constant dense<0.000000e+00> : vector<8x128xf32>
    %127 = tpu.matmul %125, %126, %cst_55 {dimension_numbers = #tpu.dot_dimension_numbers<[1], [0], [0], [1], [0, 0, 1, 1], [], []>} : vector<8x256xbf16>, vector<256x128xbf16>, vector<8x128xf32> -> vector<8x128xf32>
    %c0_56 = arith.constant 0 : index
    %c0_57 = arith.constant 0 : index
    %128 = vector.load %arg14[%c0_56, %c0_57] : memref<1x128xf32, #tpu.memory_space<vmem>>, vector<1x128xf32>
    %129 = vector.broadcast %128 : vector<1x128xf32> to vector<8x128xf32>
    %130 = arith.addf %127, %129 : vector<8x128xf32>
    %131 = arith.addf %130, %116 : vector<8x128xf32>
    %c0_58 = arith.constant 0 : index
    %c0_59 = arith.constant 0 : index
    %132 = vector.load %arg15[%c0_58, %c0_59] : memref<1x128xf32, #tpu.memory_space<vmem>>, vector<1x128xf32>
    %c0_60 = arith.constant 0 : index
    %c0_61 = arith.constant 0 : index
    %133 = vector.load %arg16[%c0_60, %c0_61] : memref<1x128xf32, #tpu.memory_space<vmem>>, vector<1x128xf32>
    %cst_62 = arith.constant dense<0.000000e+00> : vector<8xf32>
    %134 = vector.multi_reduction <add>, %131, %cst_62 [1] : vector<8x128xf32> to vector<8xf32>
    %135 = vector.shape_cast %134 : vector<8xf32> to vector<8x1xf32>
    %cst_63 = arith.constant 1.280000e+02 : f32
    %136 = vector.broadcast %cst_63 : f32 to vector<8x1xf32>
    %137 = arith.divf %135, %136 : vector<8x1xf32>
    %138 = vector.broadcast %137 : vector<8x1xf32> to vector<8x128xf32>
    %139 = arith.subf %131, %138 : vector<8x128xf32>
    %140 = arith.mulf %139, %139 : vector<8x128xf32>
    %cst_64 = arith.constant dense<0.000000e+00> : vector<8xf32>
    %141 = vector.multi_reduction <add>, %140, %cst_64 [1] : vector<8x128xf32> to vector<8xf32>
    %142 = vector.shape_cast %141 : vector<8xf32> to vector<8x1xf32>
    %cst_65 = arith.constant 1.280000e+02 : f32
    %143 = vector.broadcast %cst_65 : f32 to vector<8x1xf32>
    %144 = arith.divf %142, %143 : vector<8x1xf32>
    %cst_66 = arith.constant 9.99999974E-6 : f32
    %145 = vector.broadcast %cst_66 : f32 to vector<8x1xf32>
    %146 = arith.addf %144, %145 : vector<8x1xf32>
    %147 = math.rsqrt %146 : vector<8x1xf32>
    %148 = vector.broadcast %147 : vector<8x1xf32> to vector<8x128xf32>
    %149 = arith.mulf %139, %148 : vector<8x128xf32>
    %150 = vector.broadcast %132 : vector<1x128xf32> to vector<8x128xf32>
    %151 = arith.mulf %149, %150 : vector<8x128xf32>
    %152 = vector.broadcast %133 : vector<1x128xf32> to vector<8x128xf32>
    %153 = arith.addf %151, %152 : vector<8x128xf32>
    %c0_67 = arith.constant 0 : index
    %c0_68 = arith.constant 0 : index
    %154 = vector.load %arg19[%c0_67, %c0_68] : memref<8x128xf32, #tpu.memory_space<vmem>>, vector<8x128xf32>
    tpu.vector_store %arg19[%c0_67, %c0_68], %153 {strides = array<i32>} : memref<8x128xf32, #tpu.memory_space<vmem>>, vector<8x128xf32>,
    %c1_i32 = arith.constant 1 : i32
    %155 = arith.muli %arg0, %c1_i32 : i32
    %c0_i32 = arith.constant 0 : i32
    %156 = arith.addi %155, %c0_i32 : i32
    %157 = arith.index_cast %156 : i32 to index
    %158 = memref.load %arg1[%157] : memref<2xi32, #tpu.memory_space<smem>>
    %c0_i32_69 = arith.constant 0 : i32
    %159 = arith.addi %c0_i32_69, %158 : i32
    %160 = arith.index_cast %159 : i32 to index
    %c0_70 = arith.constant 0 : index
    %161 = vector.load %arg19[%160, %c0_70] : memref<8x128xf32, #tpu.memory_space<vmem>>, vector<1x128xf32>
    %c0_71 = arith.constant 0 : index
    %c0_72 = arith.constant 0 : index
    %c0_73 = arith.constant 0 : index
    %162 = vector.load %arg4[%c0_71, %c0_72, %c0_73] : memref<1x128x128xf32, #tpu.memory_space<vmem>>, vector<1x128x128xf32>
    %163 = vector.shape_cast %162 : vector<1x128x128xf32> to vector<128x128xf32>
    %cst_74 = arith.constant dense<0.000000e+00> : vector<1x128xf32>
    %164 = tpu.matmul %161, %163, %cst_74 {dimension_numbers = #tpu.dot_dimension_numbers<[1], [1], [0], [0], [0, 0, 1, 0], [], []>} : vector<1x128xf32>, vector<128x128xf32>, vector<1x128xf32> -> vector<1x128xf32>
    %c0_75 = arith.constant 0 : index
    %c0_76 = arith.constant 0 : index
    %c0_77 = arith.constant 0 : index
    %165 = vector.load %arg17[%c0_75, %c0_76, %c0_77] : memref<1x1x128xf32, #tpu.memory_space<vmem>>, vector<1x1x128xf32>
    %166 = vector.shape_cast %165 : vector<1x1x128xf32> to vector<1x128xf32>
    %167 = vector.shape_cast %164 : vector<1x128xf32> to vector<1x1x128xf32>
    tpu.vector_store %arg17[%c0_75, %c0_76, %c0_77], %167 {strides = array<i32>} : memref<1x1x128xf32, #tpu.memory_space<vmem>>, vector<1x1x128xf32>,
    return
  }
  func.func @transform_0(%arg0: i32, %arg1: memref<2xi32, #tpu.memory_space<smem>>) -> (i32, i32, i32) {
    %c0_i32 = arith.constant 0 : i32
    %c0_i32_0 = arith.constant 0 : i32
    %c0_i32_1 = arith.constant 0 : i32
    return %arg0, %c0_i32, %c0_i32_0 : i32, i32, i32
  }
  func.func @transform_1(%arg0: i32, %arg1: memref<2xi32, #tpu.memory_space<smem>>) -> (i32, i32, i32) {
    %c0_i32 = arith.constant 0 : i32
    %c0_i32_0 = arith.constant 0 : i32
    %c0_i32_1 = arith.constant 0 : i32
    return %arg0, %c0_i32, %c0_i32_0 : i32, i32, i32
  }
  func.func @transform_2(%arg0: i32, %arg1: memref<2xi32, #tpu.memory_space<smem>>) -> (i32, i32, i32) {
    %c0_i32 = arith.constant 0 : i32
    %c0_i32_0 = arith.constant 0 : i32
    %c0_i32_1 = arith.constant 0 : i32
    return %arg0, %c0_i32, %c0_i32_0 : i32, i32, i32
  }
  func.func @transform_3(%arg0: i32, %arg1: memref<2xi32, #tpu.memory_space<smem>>) -> (i32, i32) {
    %c0_i32 = arith.constant 0 : i32
    %c0_i32_0 = arith.constant 0 : i32
    %c0_i32_1 = arith.constant 0 : i32
    return %c0_i32, %c0_i32_0 : i32, i32
  }
  func.func @transform_4(%arg0: i32, %arg1: memref<2xi32, #tpu.memory_space<smem>>) -> (i32, i32) {
    %c0_i32 = arith.constant 0 : i32
    %c0_i32_0 = arith.constant 0 : i32
    %c0_i32_1 = arith.constant 0 : i32
    return %c0_i32, %c0_i32_0 : i32, i32
  }
  func.func @transform_5(%arg0: i32, %arg1: memref<2xi32, #tpu.memory_space<smem>>) -> (i32, i32) {
    %c0_i32 = arith.constant 0 : i32
    %c0_i32_0 = arith.constant 0 : i32
    %c0_i32_1 = arith.constant 0 : i32
    return %c0_i32, %c0_i32_0 : i32, i32
  }
  func.func @transform_6(%arg0: i32, %arg1: memref<2xi32, #tpu.memory_space<smem>>) -> (i32, i32) {
    %c0_i32 = arith.constant 0 : i32
    %c0_i32_0 = arith.constant 0 : i32
    %c0_i32_1 = arith.constant 0 : i32
    return %c0_i32, %c0_i32_0 : i32, i32
  }
  func.func @transform_7(%arg0: i32, %arg1: memref<2xi32, #tpu.memory_space<smem>>) -> (i32, i32) {
    %c0_i32 = arith.constant 0 : i32
    %c0_i32_0 = arith.constant 0 : i32
    %c0_i32_1 = arith.constant 0 : i32
    return %c0_i32, %c0_i32_0 : i32, i32
  }
  func.func @transform_8(%arg0: i32, %arg1: memref<2xi32, #tpu.memory_space<smem>>) -> (i32, i32) {
    %c0_i32 = arith.constant 0 : i32
    %c0_i32_0 = arith.constant 0 : i32
    %c0_i32_1 = arith.constant 0 : i32
    return %c0_i32, %c0_i32_0 : i32, i32
  }
  func.func @transform_9(%arg0: i32, %arg1: memref<2xi32, #tpu.memory_space<smem>>) -> (i32, i32) {
    %c0_i32 = arith.constant 0 : i32
    %c0_i32_0 = arith.constant 0 : i32
    %c0_i32_1 = arith.constant 0 : i32
    return %c0_i32, %c0_i32_0 : i32, i32
  }
  func.func @transform_10(%arg0: i32, %arg1: memref<2xi32, #tpu.memory_space<smem>>) -> (i32, i32) {
    %c0_i32 = arith.constant 0 : i32
    %c0_i32_0 = arith.constant 0 : i32
    %c0_i32_1 = arith.constant 0 : i32
    return %c0_i32, %c0_i32_0 : i32, i32
  }
  func.func @transform_11(%arg0: i32, %arg1: memref<2xi32, #tpu.memory_space<smem>>) -> (i32, i32) {
    %c0_i32 = arith.constant 0 : i32
    %c0_i32_0 = arith.constant 0 : i32
    %c0_i32_1 = arith.constant 0 : i32
    return %c0_i32, %c0_i32_0 : i32, i32
  }
  func.func @transform_12(%arg0: i32, %arg1: memref<2xi32, #tpu.memory_space<smem>>) -> (i32, i32) {
    %c0_i32 = arith.constant 0 : i32
    %c0_i32_0 = arith.constant 0 : i32
    %c0_i32_1 = arith.constant 0 : i32
    return %c0_i32, %c0_i32_0 : i32, i32
  }
  func.func @transform_13(%arg0: i32, %arg1: memref<2xi32, #tpu.memory_space<smem>>) -> (i32, i32) {
    %c0_i32 = arith.constant 0 : i32
    %c0_i32_0 = arith.constant 0 : i32
    %c0_i32_1 = arith.constant 0 : i32
    return %c0_i32, %c0_i32_0 : i32, i32
  }
  func.func @transform_14(%arg0: i32, %arg1: memref<2xi32, #tpu.memory_space<smem>>) -> (i32, i32) {
    %c0_i32 = arith.constant 0 : i32
    %c0_i32_0 = arith.constant 0 : i32
    %c0_i32_1 = arith.constant 0 : i32
    return %c0_i32, %c0_i32_0 : i32, i32
  }
  func.func @transform_15(%arg0: i32, %arg1: memref<2xi32, #tpu.memory_space<smem>>) -> (i32, i32, i32) {
    %c0_i32 = arith.constant 0 : i32
    %c0_i32_0 = arith.constant 0 : i32
    %c0_i32_1 = arith.constant 0 : i32
    return %arg0, %c0_i32, %c0_i32_0 : i32, i32, i32
  }
}

</mosaic_0001>

<bundles_post_ra>
// kernel: tpu_custom_call.1
= control target key start
LH: loop header
LB: loop body
LE: loop exit
PB: predicated region body
PF: predicated region fallthrough
CT: control target
= control target key end

     0   :  { %s3734_s0 = inlined_call_operand.hbm [shape: s32[2], index: 0, kind: input, shape index: {}]   ;;  %s3735_s1 = inlined_call_operand.hbm [shape: f32[2,8,128], index: 1, kind: input, shape index: {}]   ;;  %s3736_s2 = inlined_call_operand.vmem [shape: f32[2,1,8], index: 2, kind: input, shape index: {}]   ;;  %s3737_s3 = inlined_call_operand.hbm [shape: f32[2,128,128], index: 3, kind: input, shape index: {}]   ;;  %s3738_s4 = inlined_call_operand.hbm [shape: bf16[128,384], index: 4, kind: input, shape index: {}]   ;;  %s3739_s5 = inlined_call_operand.vmem [shape: f32[1,384], index: 5, kind: input, shape index: {}]   ;;  %s3740_s6 = inlined_call_operand.hbm [shape: bf16[128,128], index: 6, kind: input, shape index: {}]   ;;  %s3741_s7 = inlined_call_operand.vmem [shape: f32[1,128], index: 7, kind: input, shape index: {}]   ;;  %s3742_s8 = inlined_call_operand.vmem [shape: f32[1,128], index: 8, kind: input, shape index: {}]   ;;  %s3743_s9 = inlined_call_operand.vmem [shape: f32[1,128], index: 9, kind: input, shape index: {}]   ;;  %s3744_s10 = inlined_call_operand.hbm [shape: bf16[128,256], index: 10, kind: input, shape index: {}]   ;;  %s3745_s11 = inlined_call_operand.vmem [shape: f32[1,256], index: 11, kind: input, shape index: {}]   ;;  %s3746_s12 = inlined_call_operand.hbm [shape: bf16[256,128], index: 12, kind: input, shape index: {}]   ;;  %s3747_s13 = inlined_call_operand.vmem [shape: f32[1,128], index: 13, kind: input, shape index: {}]   ;;  %s3748_s14 = inlined_call_operand.vmem [shape: f32[1,128], index: 14, kind: input, shape index: {}]   ;;  %s3749_s15 = inlined_call_operand.vmem [shape: f32[1,128], index: 15, kind: input, shape index: {}]   ;;  %s3750_s16 = inlined_call_operand.hbm [shape: f32[2,1,128], index: 16, kind: output, shape index: {}]  }
   0x1   :  { %3760 = sst [smem:[#allocation25_spill]] %s3734_s0 }
   0x2   :  { %3761 = sst [smem:[#allocation26_spill]] %s3735_s1  ;;  %s3772_s23 = sld [smem:[#allocation25_spill]] }
   0x3   :  { %3762 = sst [smem:[#allocation27_spill]] %s3738_s4 }
   0x4   :  { %3763 = sst [smem:[#allocation28_spill]] %s3740_s6 }
   0x5   :  { %3764 = sst [smem:[#allocation29_spill]] %s3742_s8 }
   0x6   :  { %3765 = sst [smem:[#allocation30_spill]] %s3743_s9 }
   0x7   :  { %3766 = sst [smem:[#allocation31_spill]] %s3744_s10 }
   0x8   :  { %3767 = sst [smem:[#allocation32_spill]] %s3745_s11  ;;  %s2836_s9 = scalar_lea.hbm %s3772_s23, 16 }
   0x9   :  { %3768 = sst [smem:[#allocation33_spill]] %s3747_s13  ;;  %p2837_p0 = scmp.ne.s32.totalorder %s3772_s23, %s2836_s9 }
   0xa   :  { %3769 = sst [smem:[#allocation34_spill]] %s3748_s14  ;;  %p2840_p1 = scmp.lt.u32.totalorder %s2836_s9, %s3772_s23 }
   0xb   :  { %3770 = sst [smem:[#allocation35_spill]] %s3749_s15 }
   0xc   :  { %3771 = sst [smem:[#allocation36_spill]] %s3750_s16  ;;  %p2842_p2 = pnand %p2840_p1, %p2837_p0 }
   0xe   :  { %2845 = shalt.err (!%p2842_p2)  }
   0xf   :  { %s3104_s28 = smov [#allocation5]  }
  0x10   :  { %22 = dma.hbm_to_smem %s3772_s23, 16, %s3104_s28, [#allocation4] }
  0x11   :  { %3062 = dma.done.wait [#allocation4], 16 }
  0x12   :  { %3063 = vsyncadd [#allocation4], 4294967280 }
  0x13   :  { %24 = sfence }
  0x14   :  { %25 = vsyncpa [#allocation7], 0 }
  0x15   :  { %27 = vsyncpa [#allocation7 + $0x1], 0 }
  0x16   :  { %28 = vsyncpa [#allocation10], 0 }
  0x17   :  { %30 = vsyncpa [#allocation10 + $0x1], 0 }
  0x18   :  { %31 = vsyncpa [#allocation13], 0 }
  0x19   :  { %32 = vsyncpa [#allocation16], 0 }
  0x1a   :  { %33 = vsyncpa [#allocation8], 0 }
  0x1b   :  { %35 = vsyncpa [#allocation8 + $0x1], 0  ;;  %s3222_s0 = smov 0   ;;  %s3224_s9 = smov 0  }
  0x1c   :  { %s3226_s17 = smov 0   ;;  %s3228_s18 = smov 0  }
  0x1d LB: > { %s3105_s19 = smov [#allocation11]   ;;  %s3243_s21 = sadd.s32 4294967295, %s3102_s18   ;;  %s3102_s18 = sphi %s3228_s18, %s3811_s18   ;;  %s3098_s17 = sphi %s3226_s17, %s3810_s17   ;;  %s3094_s9 = sphi %s3224_s9, %s3809_s9   ;;  %s3090_s0 = sphi %s3222_s0, %s3808_s0  }
  0x1e   : > { %s414_s20 = sshll.u32 %s3105_s19, 4  ;;  %p2313_p3 = scmp.ge.s32.totalorder %s3102_s18, 1  ;;  %s3248_s20 = int_to_ptr.vmem [resolvable:$true] %s414_s20 }
  0x1f   : > { %p3753_p4 = scmp.eq.s32.totalorder %s3243_s21, 0  ;;  %p402_p5 = scmp.lt.s32.totalorder %s3102_s18, 3 }
  0x20   : > { %s3106_s23 = smov [#allocation12]   ;;  %s3107_s26 = smov [#allocation14]  }
  0x21   : > { %p3250_p6 = pnand %p2313_p3, %p402_p5  ;;  %s430_s24 = sshll.u32 %s3106_s23, 4  ;;  %s3263_s24 = int_to_ptr.vmem [resolvable:$true] %s430_s24 }
  0x22   : > { %s3265_s27 = sshll.u32 %s3107_s26, 4  ;;  %s3775_s4 = sld [smem:[#allocation27_spill]]  ;;  %s453_s27 = int_to_ptr.vmem [resolvable:$true] %s3265_s27 }
  0x23   : > { %s3773_s22 = scalar_select %p3250_p6, 1, 0 }
  0x24   : > { %p2652_p8 = pneg %p3250_p6 }
  0x26   : > { %p3259_p9 = pnand %p2652_p8, %p3753_p4 }
  0x28   : > { %s2846_s30 = scalar_lea.hbm %s3775_s4, 3072  ;;  %p3275_p11 = pneg %p3259_p9 }
  0x29   : > { %p2847_p10 = scmp.ne.s32.totalorder %s3775_s4, %s2846_s30  ;;  %p2853_p0 = scmp.lt.u32.totalorder %s2846_s30, %s3775_s4 }
  0x2b   : > { %p2849_p12 = pnand %p3275_p11, %p2847_p10 }
  0x2d   : > { %p2850_p13 = pneg %p2849_p12 }
  0x2f   : > { %p2855_p1 = pnand %p2853_p0, %p2850_p13 }
  0x31   : > { %2858 = shalt.err (!%p2855_p1)
}
  0x32   : > { %s2859_s16 = scalar_lea.vmem %s3248_s20, 3072  ;;  %p2867_p8 = scmp.lt.s32.totalorder %s3248_s20, %s3248_s20 }
  0x33   : > { %p2860_p2 = scmp.ne.s32.totalorder %s3248_s20, %s2859_s16  ;;  %p2868_p7 = scmp.lt.s32.totalorder %s2859_s16, %s2859_s16 }
  0x35   : > { %p2862_p3 = pnand %p2860_p2, %p3275_p11  ;;  %p2869_p10 = por %p2868_p7, %p2867_p8 }
  0x37   : > { %p2863_p5 = pneg %p2862_p3 }
  0x39   : > { %p2870_p12 = pnand %p2869_p10, %p2863_p5 }
  0x3b   : > { %2873 = shalt.err (!%p2870_p12)
}
  0x3c   : > { %s3108_s28 = smov 192   ;;  %s3109_s15 = smov 12  }
  0x3d   : > { %2655 = dma.hbm_to_vmem [thread:$0]  (!%p3259_p9), %s3775_s4, 3072, %s3248_s20, [#allocation10], %s3108_s28, %s3108_s28, %s3109_s15  }
  0x3e   : > { %s3777_s6 = sld [smem:[#allocation28_spill]] }
  0x44   : > { %s2874_s14 = scalar_lea.hbm %s3777_s6, 1024 }
  0x45   : > { %p2875_p7 = scmp.ne.s32.totalorder %s3777_s6, %s2874_s14  ;;  %p2881_p1 = scmp.lt.u32.totalorder %s2874_s14, %s3777_s6 }
  0x47   : > { %p2877_p13 = pnand %p2875_p7, %p3275_p11 }
  0x49   : > { %p2878_p0 = pneg %p2877_p13 }
  0x4b   : > { %p2883_p2 = pnand %p2881_p1, %p2878_p0 }
  0x4d   : > { %2886 = shalt.err (!%p2883_p2)
}
  0x4e   : > { %s2887_s20 = scalar_lea.vmem %s3263_s24, 1024  ;;  %p2895_p10 = scmp.lt.s32.totalorder %s3263_s24, %s3263_s24 }
  0x4f   : > { %p2888_p3 = scmp.ne.s32.totalorder %s3263_s24, %s2887_s20  ;;  %p2896_p12 = scmp.lt.s32.totalorder %s2887_s20, %s2887_s20 }
  0x51   : > { %p2890_p5 = pnand %p2888_p3, %p3275_p11  ;;  %p2897_p7 = por %p2896_p12, %p2895_p10 }
  0x53   : > { %p2891_p8 = pneg %p2890_p5 }
  0x55   : > { %p2898_p13 = pnand %p2897_p7, %p2891_p8 }
  0x57   : > { %2901 = shalt.err (!%p2898_p13)
}
  0x58   : > { %s3755_s11 = smov 64   ;;  %s3756_s8 = smov 4  }
  0x59   : > { %2658 = dma.hbm_to_vmem [thread:$0]  (!%p3259_p9), %s3777_s6, 1024, %s3263_s24, [#allocation13], %s3755_s11, %s3755_s11, %s3756_s8  }
  0x5a   : > { %s3778_s10 = sld [smem:[#allocation31_spill]] }
  0x60   : > { %s2902_s29 = scalar_lea.hbm %s3778_s10, 2048 }
  0x61   : > { %p2903_p0 = scmp.ne.s32.totalorder %s3778_s10, %s2902_s29  ;;  %p2909_p3 = scmp.lt.u32.totalorder %s2902_s29, %s3778_s10 }
  0x63   : > { %p2905_p1 = pnand %p2903_p0, %p3275_p11 }
  0x65   : > { %p2906_p2 = pneg %p2905_p1 }
  0x67   : > { %p2911_p5 = pnand %p2909_p3, %p2906_p2 }
  0x69   : > { %2914 = shalt.err (!%p2911_p5)
}
  0x6a   : > { %s2915_s20 = scalar_lea.vmem %s453_s27, 2048  ;;  %p2923_p7 = scmp.lt.s32.totalorder %s453_s27, %s453_s27 }
  0x6b   : > { %p2916_p8 = scmp.ne.s32.totalorder %s453_s27, %s2915_s20  ;;  %p2924_p13 = scmp.lt.s32.totalorder %s2915_s20, %s2915_s20 }
  0x6d   : > { %p2918_p10 = pnand %p2916_p8, %p3275_p11  ;;  %p2925_p4 = por %p2924_p13, %p2923_p7 }
  0x6f   : > { %p2919_p12 = pneg %p2918_p10 }
  0x71   : > { %p2926_p6 = pnand %p2925_p4, %p2919_p12 }
  0x73   : > { %2929 = shalt.err (!%p2926_p6)
}
  0x74   : > { %s3757_s24 = smov 128   ;;  %s3758_s13 = smov 8  }
  0x75   : > { %2661 = dma.hbm_to_vmem [thread:$0]  (!%p3259_p9), %s3778_s10, 2048, %s453_s27, [#allocation13], %s3757_s24, %s3757_s24, %s3758_s13  }
  0x76   : > { %s3114_s15 = smov [#allocation15]   ;;  %s2930_s26 = scalar_lea.hbm %s3746_s12, 2048 }
  0x77   : > { %s468_s29 = sshll.u32 %s3114_s15, 4  ;;  %p2931_p4 = scmp.ne.s32.totalorder %s3746_s12, %s2930_s26  ;;  %s469_s29 = int_to_ptr.vmem [resolvable:$true] %s468_s29 }
  0x78   : > { %p2937_p1 = scmp.lt.u32.totalorder %s2930_s26, %s3746_s12 }
  0x79   : > { %p2933_p6 = pnand %p2931_p4, %p3275_p11 }
  0x7b   : > { %p2934_p0 = pneg %p2933_p6 }
  0x7d   : > { %p2939_p2 = pnand %p2937_p1, %p2934_p0 }
  0x7f   : > { %2942 = shalt.err (!%p2939_p2)
}
  0x80   : > { %s2943_s27 = scalar_lea.vmem %s469_s29, 2048  ;;  %p2951_p10 = scmp.lt.s32.totalorder %s469_s29, %s469_s29 }
  0x81   : > { %p2944_p3 = scmp.ne.s32.totalorder %s469_s29, %s2943_s27  ;;  %p2952_p12 = scmp.lt.s32.totalorder %s2943_s27, %s2943_s27 }
  0x83   : > { %p2946_p5 = pnand %p2944_p3, %p3275_p11  ;;  %p2953_p7 = por %p2952_p12, %p2951_p10 }
  0x85   : > { %p2947_p8 = pneg %p2946_p5 }
  0x87   : > { %p2954_p13 = pnand %p2953_p7, %p2947_p8 }
  0x89   : > { %2957 = shalt.err (!%p2954_p13)
}
  0x8a   : > { %s3779_s14 = smov 4   ;;  %s3780_s28 = smov 64  }
  0x8b   : > { %2664 = dma.hbm_to_vmem [thread:$0]  (!%p3259_p9), %s3746_s12, 2048, %s469_s29, [#allocation16], %s3780_s28, %s3780_s28, %s3779_s14  }
  0x8c   : > { %s2312_s25 = sadd.s32 4294967294, %s3102_s18   ;;  %s3367_s23 = sadd.s32 1, %s3102_s18  }
  0x8d   : > { %s45_s15 = ssub.s32 %s3102_s18, %s3367_s23  ;;  %s48_s30 = sadd.s32 1, %s3098_s17 }
  0x8e   : > { %p46_p11 = scmp.eq.s32.totalorder %s45_s15, 0  ;;  %p55_p4 = scmp.ne.s32.totalorder %s3098_s17, %s3094_s9 }
  0x8f   : > { %p56_p6 = scmp.eq.s32.totalorder %s3102_s18, 0  ;;  %p61_p0 = scmp.ne.s32.totalorder %s3094_s9, %s3090_s0 }
  0x90   : > { %s3378_s19 = scalar_select %p46_p11, %s3098_s17, %s48_s30  }
  0x91   : > { %p3380_p1 = por %p56_p6, %p55_p4  ;;  %p3782_p2 = scmp.eq.s32.totalorder %s3243_s21, 0 }
  0x92   : > { %p389_p3 = scmp.eq.s32.totalorder %s3243_s21, 1  ;;  %p395_p5 = scmp.eq.s32.totalorder %s2312_s25, 1 }
  0x93   : > { %p3386_p9 = por %p3782_p2, %p61_p0  ;;  %p2680_p8 = scmp.lt.s32.totalorder %s3102_s18, 2 }
  0x94   : > { %s3393_s16 = sand.u32 1, %s3098_s17   ;;  %p3395_p10 = por %p389_p3, %p55_p4 }
  0x95   : > { %p3399_p12 = por %p395_p5, %p61_p0  ;;  %s2319_s14 = sshll.u32 %s3393_s16, 3 }
  0x96   : > { %s3784_s20 = scalar_select %p3395_p10, 1, 0 }
  0x97   : > { %s3785_s27 = scalar_select %p3399_p12, 1, 0 }
  0x98   : > { %s2320_s28 = sshll.u32 %s3102_s18, 7  ;;  %s3786_s1 = sld [smem:[#allocation26_spill]] }
  0x99   : > { %s495_s15 = scalar_lea.vmem [#allocation6], %s2319_s14  ;;  %p3414_p7 = pnand %p2680_p8, %p3380_p1 }
  0x9a   : > { %s502_s30 = sshll.u32 %s495_s15, 4  ;;  %s2321_s13 = sshll.u32 %s3393_s16, 7  ;;  %s3410_s30 = int_to_ptr.vmem [resolvable:$true] %s502_s30 }
  0x9b   : > { %s492_s11 = scalar_lea.sflag [#allocation7], %s3393_s16  ;;  %p2960_p11 = pneg %p3414_p7 }
  0x9e   : > { %s3408_s25 = scalar_lea.hbm %s3786_s1, %s2320_s28  ;;  %s2963_s26 = scalar_lea.hbm %s3786_s1, 256 }
  0x9f   : > { %s2958_s28 = scalar_lea.hbm %s3408_s25, 128  ;;  %p2964_p0 = scmp.lt.u32.totalorder %s3408_s25, %s3786_s1 }
  0xa0   : > { %p2959_p13 = scmp.ne.s32.totalorder %s3408_s25, %s2958_s28  ;;  %p2965_p1 = scmp.lt.u32.totalorder %s2963_s26, %s2958_s28 }
  0xa1   : > { %p2967_p3 = scmp.lt.u32.totalorder %s2958_s28, %s3408_s25 }
  0xa2   : > { %p2961_p4 = pnand %p2960_p11, %p2959_p13  ;;  %p2966_p2 = por %p2965_p1, %p2964_p0 }
  0xa4   : > { %p2962_p6 = pneg %p2961_p4  ;;  %p2968_p5 = por %p2967_p3, %p2966_p2 }
  0xa6   : > { %p2969_p8 = pnand %p2968_p5, %p2962_p6 }
  0xa8   : > { %2972 = shalt.err (!%p2969_p8)
}
  0xa9   : > { %s2973_s4 = scalar_lea.vmem %s3410_s30, 128  ;;  %s3115_s14 = smov [#allocation6]  }
  0xaa   : > { %p2974_p13 = scmp.ne.s32.totalorder %s3410_s30, %s2973_s4  ;;  %s2978_s8 = sshll.u32 %s3115_s14, 4  ;;  %s2979_s8 = int_to_ptr.vmem [resolvable:$false] %s2978_s8 }
  0xab   : > { %s2980_s6 = scalar_lea.vmem %s2979_s8, 256  ;;  %p2981_p10 = scmp.lt.s32.totalorder %s3410_s30, %s2979_s8 }
  0xac   : > { %p2976_p4 = pnand %p2974_p13, %p2960_p11  ;;  %p2982_p0 = scmp.lt.s32.totalorder %s2980_s6, %s2973_s4 }
  0xae   : > { %p2977_p12 = pneg %p2976_p4  ;;  %p2983_p1 = por %p2982_p0, %p2981_p10 }
  0xb0   : > { %p2984_p2 = pnand %p2983_p1, %p2977_p12 }
  0xb2   : > { %2987 = shalt.err (!%p2984_p2)
}
  0xb3   : > { %2668 = dma.hbm_to_vmem [thread:$0]  (!%p3414_p7), %s3408_s25, 128, %s3410_s30, %s492_s11  }
  0xb4   : > { %s519_s28 = scalar_lea.vmem [#allocation9], %s2321_s13  ;;  %s2417_s15 = sshll.u32 %s3102_s18, 11 }
  0xb5   : > { %s526_s26 = sshll.u32 %s519_s28, 4  ;;  %s3454_s8 = scalar_lea.hbm %s3737_s3, %s2417_s15  ;;  %s3448_s26 = int_to_ptr.vmem [resolvable:$true] %s526_s26 }
  0xb6   : > { %s3788_s6 = sand.u32 1, %s3102_s18   ;;  %s2988_s10 = scalar_lea.hbm %s3454_s8, 2048 }
  0xb7   : > { %s3458_s1 = scalar_lea.sflag [#allocation10], %s3788_s6  ;;  %p2989_p10 = scmp.ne.s32.totalorder %s3454_s8, %s2988_s10 }
  0xb8   : > { %s2993_s25 = scalar_lea.hbm %s3737_s3, 4096  ;;  %p2994_p3 = scmp.lt.u32.totalorder %s3454_s8, %s3737_s3 }
  0xb9   : > { %p2991_p12 = pnand %p2989_p10, %p2960_p11  ;;  %p2995_p5 = scmp.lt.u32.totalorder %s2993_s25, %s2988_s10 }
  0xba   : > { %p2997_p13 = scmp.lt.u32.totalorder %s2988_s10, %s3454_s8 }
  0xbb   : > { %p2992_p6 = pneg %p2991_p12  ;;  %p2996_p8 = por %p2995_p5, %p2994_p3 }
  0xbd   : > { %p2998_p4 = por %p2997_p13, %p2996_p8 }
  0xbf   : > { %p2999_p0 = pnand %p2998_p4, %p2992_p6 }
  0xc1   : > { %3002 = shalt.err (!%p2999_p0)
}
  0xc2   : > { %s3003_s28 = scalar_lea.vmem %s3448_s26, 2048  ;;  %s3116_s15 = smov [#allocation9]  }
  0xc3   : > { %p3004_p1 = scmp.ne.s32.totalorder %s3448_s26, %s3003_s28  ;;  %s3008_s14 = sshll.u32 %s3116_s15, 4  ;;  %s3009_s14 = int_to_ptr.vmem [resolvable:$false] %s3008_s14 }
  0xc4   : > { %s3010_s4 = scalar_lea.vmem %s3009_s14, 4096  ;;  %p3011_p12 = scmp.lt.s32.totalorder %s3448_s26, %s3009_s14 }
  0xc5   : > { %p3006_p2 = pnand %p3004_p1, %p2960_p11  ;;  %p3012_p3 = scmp.lt.s32.totalorder %s3010_s4, %s3003_s28 }
  0xc7   : > { %p3007_p10 = pneg %p3006_p2  ;;  %p3013_p5 = por %p3012_p3, %p3011_p12 }
  0xc9   : > { %p3014_p8 = pnand %p3013_p5, %p3007_p10 }
  0xcb   : > { %3017 = shalt.err (!%p3014_p8)
}
  0xcc   : > { %s3789_s10 = smov 8   ;;  %s3790_s6 = smov 128  }
  0xcd   : > { %2671 = dma.hbm_to_vmem [thread:$0]  (!%p3414_p7), %s3454_s8, 2048, %s3448_s26, %s3458_s1, %s3790_s6, %s3790_s6, %s3789_s10  }
  0xce   : > { %p3791_p11 = scmp.ne.s32.totalorder %s3773_s22, 0 }
  0xcf   : > { %s3490_s13 = sand.u32 (!%p3791_p11), 1, %s3094_s9  }
  0xd0   : > { %538 = sbr.rel (%p3791_p11) target bundleno = 3832 (0xef8), region = 80  ;;  %s2325_s16 = sshll.u32 (!%p3791_p11), %s3490_s13, 3 }
  0xd1   : > { %s541_s25 = scalar_lea.sflag (!%p3791_p11), [#allocation7], %s3490_s13  ;;  %s3494_s30 = scalar_lea.vmem (!%p3791_p11), [#allocation6], %s2325_s16 }
  0xd7   : > { %3065 = dma.done.wait (%p3386_p9), %s541_s25, 128  }
  0xd8   : > { %3067 = vsyncadd (%p3386_p9), %s541_s25, 4294967168  ;;  %s549_s1 = sand.u32 1, %s3243_s21   ;;  %s2326_s22 = sshll.u32 %s3490_s13, 7 }
  0xd9   : > { %s550_s24 = scalar_lea.sflag [#allocation10], %s549_s1  ;;  %s3502_s26 = scalar_lea.vmem [#allocation9], %s2326_s22 }
  0xda   : > { %3069 = dma.done.wait (%p3386_p9), %s550_s24, 2048  }
  0xdb   : > { %3071 = vsyncadd (%p3386_p9), %s550_s24, 4294965248  ;;  %p3792_p7 = scmp.eq.s32.totalorder %s3243_s21, 0 }
  0xdd   : > { %3073 = dma.done.wait (%p3792_p7), [#allocation10], 3072   ;;  %p3793_p6 = pmov %p3792_p7 }
  0xdf   : > { %3075 = vsyncadd (%p3793_p6), [#allocation10], 4294964224  ;;  %p3794_p13 = pmov %p3793_p6 }
  0xe0   : > { %p3795_p4 = pmov %p3793_p6 }
  0xe1   : > { %3077 = dma.done.wait (%p3794_p13), [#allocation13], 3072  }
  0xe2   : > { %3079 = vsyncadd (%p3795_p4), [#allocation13], 4294964224  ;;  %p3796_p0 = pmov %p3795_p4 }
  0xe4   : > { %3081 = dma.done.wait (%p3796_p0), [#allocation16], 2048   ;;  %p3797_p1 = pmov %p3796_p0 }
  0xe5   : > { %v3117_v0 = vmov 0   ;;  %v2736_v1 = vld [vmem:[#allocation11 + $0x4] ss:$12 sps:$4 sm:$0xff]   ;;  %v2738_v2 = vld [vmem:[#allocation11] ss:$12 sps:$4 sm:$0xff]   ;;  %v3118_v20 = vmov 0.0   ;;  %v663_v28 = vlaneseq }
  0xe6   : > { %3083 = vsyncadd (%p3797_p1), [#allocation16], 4294965248  ;;  %838 = vmatprep.mubr.bf16.mxu0 %v3117_v0  ;;  %806 = vmatprep.subr.bf16.mxu0 %v2736_v1  ;;  %v2739_v3 = vld [vmem:[#allocation11 + $0x1c] ss:$12 sps:$4 sm:$0xff]   ;;  %v2741_v4 = vld [vmem:[#allocation11 + $0x18] ss:$12 sps:$4 sm:$0xff]  }
  0xe7   : > { %807 = vmatpush1.bf16.msra.mxu0 %v2738_v2  ;;  %v2742_v5 = vld [vmem:[#allocation11 + $0x34] ss:$12 sps:$4 sm:$0xff]   ;;  %v2744_v6 = vld [vmem:[#allocation11 + $0x30] ss:$12 sps:$4 sm:$0xff]   ;;  %v2745_v7 = vld [vmem:[#allocation11 + $0x4c] ss:$12 sps:$4 sm:$0xff]   ;;  %2491 = vmatprep.subr.bf16.mxu1 %v3118_v20 }
  0xe8   : > { %808 = vmatprep.subr.bf16.mxu0 %v2739_v3  ;;  %v2747_v8 = vld [vmem:[#allocation11 + $0x48] ss:$12 sps:$4 sm:$0xff]   ;;  %v2748_v9 = vld [vmem:[#allocation11 + $0x64] ss:$12 sps:$4 sm:$0xff]   ;;  %v2750_v10 = vld [vmem:[#allocation11 + $0x60] ss:$12 sps:$4 sm:$0xff]  }
  0xe9   : > { %v2751_v11 = vld [vmem:[#allocation11 + $0x7c] ss:$12 sps:$4 sm:$0xff]   ;;  %v2753_v12 = vld [vmem:[#allocation11 + $0x78] ss:$12 sps:$4 sm:$0xff]   ;;  %v2754_v13 = vld [vmem:[#allocation11 + $0x94] ss:$12 sps:$4 sm:$0xff]  }
  0xea   : > { %v2756_v14 = vld [vmem:[#allocation11 + $0x90] ss:$12 sps:$4 sm:$0xff]   ;;  %v2757_v15 = vld [vmem:[#allocation11 + $0xac] ss:$12 sps:$4 sm:$0xff]   ;;  %v2759_v16 = vld [vmem:[#allocation11 + $0xa8] ss:$12 sps:$4 sm:$0xff]  }
  0xeb   : > { %809 = vmatpush1.bf16.msra.mxu0 %v2741_v4  ;;  %v3522_v17 = vld [vmem:[%s3494_s30] sm:$0xff]  ;;  %v2761_v21 = vld [vmem:[#allocation11 + $0x20] ss:$12 sps:$4 sm:$0xff]   ;;  %vm3119_vm0 = vmmov 0   ;;  %v3542_v29 = vshrl.u32 %v663_v28, 7  ;;  %vm895_vm1 = vcmask 261120  }
  0xec   : > { %810 = vmatprep.subr.bf16.mxu0 %v2742_v5  ;;  %v628_v18 = vpack.c.bf16 %v3522_v17, %v3522_v17  ;;  %v2760_v19 = vld [vmem:[#allocation11 + $0x8] ss:$12 sps:$4 sm:$0xff]   ;;  %2507 = vmatprep.mubr.msk.bf16.mxu1 %vm3119_vm0, %v3118_v20  ;;  %v2762_v22 = vld [vmem:[#allocation11 + $0x38] ss:$12 sps:$4 sm:$0xff]   ;;  %v2763_v23 = vld [vmem:[#allocation11 + $0x50] ss:$12 sps:$4 sm:$0xff]  }
  0xed   : > { %2492 = vmatpush3.bf16.msra.mxu1 %v2760_v19  ;;  %v2764_v24 = vld [vmem:[#allocation11 + $0x68] ss:$12 sps:$4 sm:$0xff]   ;;  %v2765_v25 = vld [vmem:[#allocation11 + $0x80] ss:$12 sps:$4 sm:$0xff]   ;;  %v2766_v26 = vld [vmem:[#allocation11 + $0x98] ss:$12 sps:$4 sm:$0xff]  }
  0xee   : > { %2493 = vmatprep.subr.bf16.mxu1 %v3118_v20  ;;  %v2767_v27 = vld [vmem:[#allocation11 + $0xb0] ss:$12 sps:$4 sm:$0xff]   ;;  %v665_v30 = vsub.s32 0, %v3542_v29  ;;  %v661_v31 = vld [vmem:[%s3739_s5] sm:$0x7]  ;;  %v669_v32 = vsub.s32 1, %v3542_v29 }
  0xef   : > { %811 = vmatpush1.bf16.msra.mxu0 %v2744_v6  ;;  %s3120_s11 = smov 96   ;;  %v673_v42 = vsub.s32 2, %v3542_v29  ;;  %p623_p9 = scmp.lt.s32.totalorder %s3243_s21, 1  ;;  %vm972_vm2 = vcmask 64512   ;;  %vm1228_vm3 = vcmask 523520   ;;  %vm1399_vm4 = vcmask 785920  }
  0xf0   : > { %812 = vmatprep.subr.bf16.mxu0 %v2745_v7  ;;  %v666_v33 = vrot.slane %v661_v31, %v665_v30  ;;  %v670_v34 = vrot.slane %v661_v31, %v669_v32  ;;  %s3121_s10 = smov 64   ;;  %s3122_s6 = smov 32   ;;  %vm1570_vm5 = vcmask 1048320  }
  0xf1   : > { %2494 = vmatpush3.bf16.msra.mxu1 %v2761_v21  ;;  %v674_v43 = vrot.slane %v661_v31, %v673_v42  ;;  %s624_s28 = scalar_select %p623_p9, %s3243_s21, 1 }
  0xf2   : > { %2495 = vmatprep.subr.bf16.mxu1 %v3118_v20  ;;  %s3798_s22 = sld [smem:[#allocation29_spill]]  ;;  %s3799_s8 = sld [smem:[#allocation30_spill]] }
  0xf3   : > { %813 = vmatpush1.bf16.msra.mxu0 %v2747_v8  ;;  %s625_s4 = scalar_lea.vmem %s3736_s2, %s624_s28  ;;  %s3800_s15 = sld [smem:[#allocation32_spill]] }
  0xf4   : > { %814 = vmatprep.subr.bf16.mxu0 %v2748_v9  ;;  %v3569_v49 = vld [vmem:[%s625_s4] ss:$0 sm:$0xff]  ;;  %s3802_s25 = sld [smem:[#allocation34_spill]]  ;;  %s622_s29 = scalar_lea.vmem [#allocation17], %s3490_s13 }
  0xf5   : > { %2496 = vmatpush3.bf16.msra.mxu1 %v2762_v22  ;;  %s3804_s14 = sld [smem:[#allocation36_spill]]  ;;  %p3805_p10 = scmp.ne.s32.totalorder %s3784_s20, 0 }
  0xf6   : > { %2497 = vmatprep.subr.bf16.mxu1 %v3118_v20 }
  0xf7   : > { %815 = vmatpush1.bf16.msra.mxu0 %v2750_v10 }
  0xf8   : > { %816 = vmatprep.subr.bf16.mxu0 %v2751_v11 }
  0xf9   : > { %2498 = vmatpush3.bf16.msra.mxu1 %v2763_v23 }
  0xfa   : > { %2499 = vmatprep.subr.bf16.mxu1 %v3118_v20 }
  0xfb   : > { %817 = vmatpush1.bf16.msra.mxu0 %v2753_v12 }
  0xfc   : > { %818 = vmatprep.subr.bf16.mxu0 %v2754_v13 }
  0xfd   : > { %2500 = vmatpush3.bf16.msra.mxu1 %v2764_v24 }
  0xfe   : > { %2501 = vmatprep.subr.bf16.mxu1 %v3118_v20 }
  0xff   : > { %819 = vmatpush1.bf16.msra.mxu0 %v2756_v14 }
 0x100   : > { %820 = vmatprep.subr.bf16.mxu0 %v2757_v15 }
 0x101   : > { %2502 = vmatpush3.bf16.msra.mxu1 %v2765_v25 }
 0x102   : > { %2503 = vmatprep.subr.bf16.mxu1 %v3118_v20 }
 0x103   : > { %821 = vmatpush1.bf16.msra.mxu0 %v2759_v16 }
 0x104   : > { %2511 = vmatprep.subr.mxu0 %v3118_v20 }
 0x105   : > { %2504 = vmatpush3.bf16.msra.mxu1 %v2766_v26 }
 0x106   : > { %839 = vmatmul.mubr.bf16.vlgmr.msra.gmra.mrb[0].mxu0 %v628_v18  ;;  %2505 = vmatprep.subr.bf16.mxu1 %v3118_v20 }
 0x107   : > { %2513 = vmatprep.mubr.msk.f32.mxu0 %vm3119_vm0, %v3118_v20 }
 0x109   : > { %2506 = vmatpush3.bf16.msra.mxu1 %v2767_v27 }
 0x10a   : > { %2546 = vmatprep.subr.mxu1 %v3118_v20 }
 0x10c   : > { %2508 = vmatmul.mubr.bf16.vlgmr.msra.gmra.mrb[0].mxu1 %v628_v18 }
 0x10d   : > { %2548 = vmatprep.mubr.msk.f32.mxu1 %vm3119_vm0, %v3118_v20 }
 0x1d9   : > { %v840_v35 = vpop.f32.mrb[0].mxu0 }
 0x1da   : > { %v841_v36 = vadd.f32 %v840_v35, %v666_v33  ;;  %v842_v37 = vpop.f32.mrb[1].mxu0 }
 0x1db   : > { %v843_v38 = vadd.f32 %v842_v37, %v670_v34  ;;  %v844_v39 = vpop.f32.mrb[2].mxu0 }
 0x1dc   : > { %v887_v40 = vmul.f32 0.17677669, %v841_v36  ;;  %v845_v41 = vpop.f32.mrb[3].mxu0 }
 0x1dd   : > { %2512 = vmatpush3.xpose.msk.msra.mxu0 %vm895_vm1, %v843_v38 }
 0x1de   : > { %1058 = vrot.lane.b32.xlu1 %v887_v40, %s3120_s11  ;;  %2516 = vmatprep.subr.mxu0 %v3118_v20 }
 0x1df   : > { %v881_v44 = vpop.f32.mrb[0].mxu1 }
 0x1e0   : > { %2514 = vmatmul.mubr.msk.f32.vlgmr.msra.gmra.mrb[4].mxu0 %vm895_vm1, %v887_v40  ;;  %v3560_v45 = vadd.f32 %v881_v44, %v674_v43  ;;  %v2509_v46 = vpop.f32.mrb[1].mxu1 }
 0x1e1   : > { %2518 = vmatprep.mubr.msk.f32.mxu0 %vm3119_vm0, %v3118_v20  ;;  %v884_v47 = vpop.f32.mrb[2].mxu1 }
 0x1e2   : > { %2517 = vmatpush3.msra.mxu0 %v3560_v45  ;;  %v2510_v48 = vpop.f32.mrb[3].mxu1 }
 0x1e3   : > { %2521 = vmatprep.subr.mxu0 %v3118_v20 }
 0x250   : > { %v1059_v59 = vpop.permute.xlu1 %1058 }
 0x2b3   : > { %v968_v50 = vpop.f32.mrb[4].mxu0 }
 0x2b4   : > { %v969_v51 = vadd.f32 %v3569_v49, %v968_v50  ;;  %v2515_v52 = vpop.f32.mrb[5].mxu0  ;;  %v2769_v50 = vld [vmem:[#allocation12 + $0x8] sm:$0xff]  }
 0x2b5   : > { %v2772_v52 = vld [vmem:[#allocation12 + $0x20] sm:$0xff]  }
 0x2b6   : > { %v973_v53 = vsel %vm972_vm2, %v969_v51, -inf }
 0x2b7   : > { %974 = vmax.xlane.f32.xlu0 %v973_v53  ;;  %v2773_v53 = vld [vmem:[#allocation12 + $0x28] sm:$0xff]  }
 0x2cd   : > { %1060 = vrot.lane.b32.xlu0 %v843_v38, %s3120_s11 }
 0x2d1   : > { %1146 = vrot.lane.b32.xlu0 %v3560_v45, %s3120_s11 }
 0x2d5   : > { %1232 = vrot.lane.b32.xlu0 %v843_v38, %s3121_s10 }
 0x2d9   : > { %1230 = vrot.lane.b32.xlu0 %v887_v40, %s3121_s10 }
 0x344   : > { %v975_v54 = vpop.xlane.xlu0 %974 }
 0x345   : > { %v976_v55 = vsub.f32 %v969_v51, %v975_v54  ;;  %v2770_v51 = vld [vmem:[#allocation12 + $0x10] sm:$0xff]  }
 0x347   : > { %v977_v56 = vmul.f32 1.442695, %v976_v55 }
 0x348   : > { %v1061_v57 = vpop.permute.xlu0 %1060 }
 0x349   : > { %2816 = vpow2.f32 %v977_v56 }
 0x34c   : > { %v1147_v60 = vpop.permute.xlu0 %1146 }
 0x350   : > { %v1233_v7 = vpop.permute.xlu0 %1232 }
 0x353   : > { %v3578_v58 = vpop.eup %2816 }
 0x354   : > { %2519 = vmatmul.mubr.msk.f32.vlgmr.msra.gmra.mrb[6].mxu0 %vm972_vm2, %v3578_v58  ;;  %v1231_v9 = vpop.permute.xlu0 %1230  ;;  %v979_v46 = vsel %vm972_vm2, %v3578_v58, 0.0 }
 0x355   : > { %2522 = vmatpush3.xpose.msk.msra.mxu0 %vm895_vm1, %v1061_v57  ;;  %2523 = vmatprep.mubr.msk.f32.mxu0 %vm3119_vm0, %v3118_v20 }
 0x356   : > { %2526 = vmatprep.subr.mxu0 %v3118_v20 }
 0x358   : > { %2524 = vmatmul.mubr.msk.f32.vlgmr.msra.gmra.mrb[8].mxu0 %vm895_vm1, %v1059_v59 }
 0x359   : > { %2527 = vmatpush3.msra.mxu0 %v1147_v60  ;;  %2528 = vmatprep.mubr.msk.f32.mxu0 %vm3119_vm0, %v3118_v20  ;;  %v2774_v60 = vld [vmem:[#allocation12 + $0x30] sm:$0xff]  }
 0x35a   : > { %2531 = vmatprep.subr.mxu0 %v3118_v20 }
 0x427   : > { %v3590_v61 = vpop.f32.mrb[6].mxu0 }
 0x428   : > { %v2520_v62 = vpop.f32.mrb[7].mxu0 }
 0x429   : > { %v2775_v62 = vld [vmem:[#allocation12 + $0x38] sm:$0xff]  }
 0x42b   : > { %v1132_v63 = vpop.f32.mrb[8].mxu0 }
 0x42c   : > { %v1133_v1 = vadd.f32 %v3569_v49, %v1132_v63  ;;  %v2525_v2 = vpop.f32.mrb[9].mxu0 }
 0x42e   : > { %v1136_v3 = vsel %vm972_vm2, %v1133_v1, -inf }
 0x42f   : > { %1137 = vmax.xlane.f32.xlu1 %v1136_v3 }
 0x440   : > { %1317 = vrot.lane.b32.xlu1 %v3560_v45, %s3121_s10 }
 0x444   : > { %1403 = vrot.lane.b32.xlu1 %v843_v38, %s3122_s6 }
 0x448   : > { %1401 = vrot.lane.b32.xlu1 %v887_v40, %s3122_s6 }
 0x4bc   : > { %v1138_v4 = vpop.xlane.xlu1 %1137 }
 0x4bd   : > { %v1139_v5 = vsub.f32 %v1133_v1, %v1138_v4 }
 0x4bf   : > { %v1140_v6 = vmul.f32 1.442695, %v1139_v5 }
 0x4c0   : > { %v1318_v10 = vpop.permute.xlu1 %1317 }
 0x4c1   : > { %2818 = vpow2.f32 %v1140_v6  ;;  %v2368_v6 = vld [vmem:[%s3741_s7] ss:$0 sm:$0xff] }
 0x4c4   : > { %v1404_v24 = vpop.permute.xlu1 %1403 }
 0x4c8   : > { %v1402_v26 = vpop.permute.xlu1 %1401 }
 0x4cb   : > { %v2819_v8 = vpop.eup %2818 }
 0x4cc   : > { %2529 = vmatmul.mubr.msk.f32.vlgmr.msra.gmra.mrb[10].mxu0 %vm972_vm2, %v2819_v8  ;;  %v1142_v18 = vsel %vm972_vm2, %v2819_v8, 0.0 }
 0x4cd   : > { %2532 = vmatpush3.xpose.msk.msra.mxu0 %vm895_vm1, %v1233_v7  ;;  %2533 = vmatprep.mubr.msk.f32.mxu0 %vm3119_vm0, %v3118_v20 }
 0x4ce   : > { %2536 = vmatprep.subr.mxu0 %v3118_v20 }
 0x4d0   : > { %2534 = vmatmul.mubr.msk.f32.vlgmr.msra.gmra.mrb[12].mxu0 %vm895_vm1, %v1231_v9 }
 0x4d1   : > { %2537 = vmatpush3.msra.mxu0 %v1318_v10  ;;  %2538 = vmatprep.mubr.msk.f32.mxu0 %vm3119_vm0, %v3118_v20 }
 0x4d2   : > { %2541 = vmatprep.subr.mxu0 %v3118_v20 }
 0x59f   : > { %v1218_v11 = vpop.f32.mrb[10].mxu0 }
 0x5a0   : > { %v2530_v12 = vpop.f32.mrb[11].mxu0 }
 0x5a3   : > { %v1304_v13 = vpop.f32.mrb[12].mxu0 }
 0x5a4   : > { %v1305_v14 = vadd.f32 %v3569_v49, %v1304_v13  ;;  %v2535_v15 = vpop.f32.mrb[13].mxu0  ;;  %v2776_v13 = vld [vmem:[#allocation14] ss:$8 sps:$4 sm:$0xff]  }
 0x5a5   : > { %v2781_v15 = vld [vmem:[#allocation14 + $0x14] ss:$8 sps:$4 sm:$0xff]  }
 0x5a6   : > { %v1308_v16 = vsel %vm972_vm2, %v1305_v14, -inf }
 0x5a7   : > { %1309 = vmax.xlane.f32.xlu0 %v1308_v16  ;;  %v2779_v16 = vld [vmem:[#allocation14 + $0x10] ss:$8 sps:$4 sm:$0xff]  }
 0x5bd   : > { %1488 = vrot.lane.b32.xlu0 %v3560_v45, %s3122_s6 }
 0x5dc   : > { %1143 = vadd.xlane.f32.xlu0 %v1142_v18  ;;  %v2784_v18 = vld [vmem:[#allocation14 + $0x24] ss:$8 sps:$4 sm:$0xff]  }
 0x634   : > { %v1310_v19 = vpop.xlane.xlu0 %1309 }
 0x635   : > { %v1311_v21 = vsub.f32 %v1305_v14, %v1310_v19  ;;  %v2778_v14 = vld [vmem:[#allocation14 + $0x4] ss:$8 sps:$4 sm:$0xff]   ;;  %v2782_v19 = vld [vmem:[#allocation14 + $0x20] ss:$8 sps:$4 sm:$0xff]  }
 0x637   : > { %v1312_v22 = vmul.f32 1.442695, %v1311_v21 }
 0x638   : > { %v1489_v23 = vpop.permute.xlu0 %1488 }
 0x639   : > { %2820 = vpow2.f32 %v1312_v22  ;;  %2547 = vmatpush3.msra.mxu1 %v1489_v23 }
 0x63a   : > { %1823 = vmatprep.subr.bf16.mxu1 %v2778_v14 }
 0x643   : > { %v2821_v25 = vpop.eup %2820 }
 0x644   : > { %2539 = vmatmul.mubr.msk.f32.vlgmr.msra.gmra.mrb[14].mxu0 %vm972_vm2, %v2821_v25  ;;  %v1314_v36 = vsel %vm972_vm2, %v2821_v25, 0.0  ;;  %v2787_v25 = vld [vmem:[#allocation14 + $0x34] ss:$8 sps:$4 sm:$0xff]  }
 0x645   : > { %2542 = vmatpush3.xpose.msk.msra.mxu0 %vm895_vm1, %v1404_v24  ;;  %2543 = vmatprep.mubr.msk.f32.mxu0 %vm3119_vm0, %v3118_v20 }
 0x646   : > { %2551 = vmatprep.subr.bf16.mxu0 %v3118_v20 }
 0x648   : > { %2544 = vmatmul.mubr.msk.f32.vlgmr.msra.gmra.mrb[16].mxu0 %vm895_vm1, %v1402_v26  ;;  %v2790_v26 = vld [vmem:[#allocation14 + $0x44] ss:$8 sps:$4 sm:$0xff]  }
 0x649   : > { %2567 = vmatprep.mubr.msk.bf16.mxu0 %vm3119_vm0, %v3118_v20 }
 0x669   : > { %v1144_v45 = vpop.xlane.xlu0 %1143 }
 0x717   : > { %v1389_v27 = vpop.f32.mrb[14].mxu0 }
 0x718   : > { %v2540_v28 = vpop.f32.mrb[15].mxu0 }
 0x719   : > { %v2793_v28 = vld [vmem:[#allocation14 + $0x54] ss:$8 sps:$4 sm:$0xff]  }
 0x71b   : > { %v1475_v31 = vpop.f32.mrb[16].mxu0 }
 0x71c   : > { %v1476_v33 = vadd.f32 %v3569_v49, %v1475_v31  ;;  %v2545_v34 = vpop.f32.mrb[17].mxu0  ;;  %v2768_v49 = vld [vmem:[#allocation12] sm:$0xff]   ;;  %v2791_v31 = vld [vmem:[#allocation14 + $0x50] ss:$8 sps:$4 sm:$0xff]  }
 0x71d   : > { %2552 = vmatpush3.bf16.msra.mxu0 %v2768_v49  ;;  %v2794_v34 = vld [vmem:[#allocation14 + $0x60] ss:$8 sps:$4 sm:$0xff]  }
 0x71e   : > { %v1479_v35 = vsel %vm972_vm2, %v1476_v33, -inf  ;;  %2553 = vmatprep.subr.bf16.mxu0 %v3118_v20 }
 0x71f   : > { %1480 = vmax.xlane.f32.xlu1 %v1479_v35  ;;  %v2799_v35 = vld [vmem:[#allocation14 + $0x74] ss:$8 sps:$4 sm:$0xff]  }
 0x721   : > { %2554 = vmatpush3.bf16.msra.mxu0 %v2769_v50 }
 0x722   : > { %2555 = vmatprep.subr.bf16.mxu0 %v3118_v20 }
 0x723   : > { %1315 = vadd.xlane.f32.xlu1 %v1314_v36  ;;  %v2797_v36 = vld [vmem:[#allocation14 + $0x70] ss:$8 sps:$4 sm:$0xff]  }
 0x725   : > { %2556 = vmatpush3.bf16.msra.mxu0 %v2770_v51 }
 0x726   : > { %2557 = vmatprep.subr.bf16.mxu0 %v3118_v20 }
 0x7ac   : > { %v1481_v37 = vpop.xlane.xlu1 %1480 }
 0x7ad   : > { %v1482_v38 = vsub.f32 %v1476_v33, %v1481_v37  ;;  %v2796_v33 = vld [vmem:[#allocation14 + $0x64] ss:$8 sps:$4 sm:$0xff]  }
 0x7ae   : > { %v2800_v37 = vld [vmem:[#allocation15 + $0x40] sm:$0xff]  }
 0x7af   : > { %v1483_v39 = vmul.f32 1.442695, %v1482_v38  ;;  %v2801_v38 = vld [vmem:[#allocation15] sm:$0xff]  }
 0x7b0   : > { %v1316_v40 = vpop.xlane.xlu1 %1315 }
 0x7b1   : > { %2822 = vpow2.f32 %v1483_v39  ;;  %v2802_v39 = vld [vmem:[#allocation15 + $0x48] sm:$0xff]  }
 0x7b2   : > { %2824 = vrcp.f32 %v1316_v40  ;;  %v2803_v40 = vld [vmem:[#allocation15 + $0x8] sm:$0xff]  }
 0x7b3   : > { %2826 = vrcp.f32 %v1144_v45  ;;  %v2808_v45 = vld [vmem:[#allocation15 + $0x60] sm:$0xff]  }
 0x7bb   : > { %v2823_v41 = vpop.eup %2822 }
 0x7bc   : > { %v2825_v42 = vpop.eup %2824  ;;  %2549 = vmatmul.mubr.msk.f32.vlgmr.msra.gmra.mrb[4].mxu1 %vm972_vm2, %v2823_v41  ;;  %v1485_v43 = vsel %vm972_vm2, %v2823_v41, 0.0  ;;  %v2804_v41 = vld [vmem:[#allocation15 + $0x50] sm:$0xff]  }
 0x7bd   : > { %1486 = vadd.xlane.f32.xlu1 %v1485_v43  ;;  %v1394_v44 = vmul.f32 %v2825_v42, %v1389_v27  ;;  %1855 = vmatprep.mubr.bf16.mxu1 %v3117_v0  ;;  %v2827_v47 = vpop.eup %2826  ;;  %v2771_v0 = vld [vmem:[#allocation12 + $0x18] sm:$0xff]   ;;  %v2788_v27 = vld [vmem:[#allocation14 + $0x40] ss:$8 sps:$4 sm:$0xff]   ;;  %v2805_v42 = vld [vmem:[#allocation15 + $0x10] sm:$0xff]  }
 0x7be   : > { %v1223_v48 = vmul.f32 %v2827_v47, %v1218_v11  ;;  %2558 = vmatpush3.bf16.msra.mxu0 %v2771_v0  ;;  %1824 = vmatpush1.bf16.msra.mxu1 %v2776_v13  ;;  %v2806_v43 = vld [vmem:[#allocation15 + $0x58] sm:$0xff]   ;;  %v2810_v47 = vld [vmem:[#allocation15 + $0x68] sm:$0xff]  }
 0x7bf   : > { %1396 = vrot.lane.b32.xlu0 %v1394_v44, %s3121_s10  ;;  %2559 = vmatprep.subr.bf16.mxu0 %v3118_v20  ;;  %v2807_v44 = vld [vmem:[#allocation15 + $0x18] sm:$0xff]   ;;  %s3801_s10 = sld [smem:[#allocation33_spill]] }
 0x7c0   : > { %1825 = vmatprep.subr.bf16.mxu1 %v2781_v15 }
 0x7c1   : > { %980 = vadd.xlane.f32.xlu1 %v979_v46  ;;  %v2809_v46 = vld [vmem:[#allocation15 + $0x20] sm:$0xff]  }
 0x7c2   : > { %2560 = vmatpush3.bf16.msra.mxu0 %v2772_v52  ;;  %1826 = vmatpush1.bf16.msra.mxu1 %v2779_v16  ;;  %v2377_v52 = vld [vmem:[%s3798_s22] ss:$0 sm:$0xff]  ;;  %v2075_v16 = vld [vmem:[%s3502_s26] sm:$0xff]  ;;  %s3803_s22 = sld [smem:[#allocation35_spill]] }
 0x7c3   : > { %2561 = vmatprep.subr.bf16.mxu0 %v3118_v20  ;;  %1827 = vmatprep.subr.bf16.mxu1 %v2784_v18  ;;  %v2076_v18 = vld [vmem:[%s3502_s26 + $0x8] sm:$0xff] }
 0x7c5   : > { %v2395_v29 = vld [vmem:[%s3801_s10] ss:$0 sm:$0xff]  ;;  %s2163_s10 = scalar_lea.sflag [#allocation8], %s3490_s13 }
 0x7c6   : > { %2562 = vmatpush3.bf16.msra.mxu0 %v2773_v53  ;;  %1828 = vmatpush1.bf16.msra.mxu1 %v2782_v19  ;;  %v3123_v19 = vmov 0.0|0.0  }
 0x7c7   : > { %2563 = vmatprep.subr.bf16.mxu0 %v3118_v20  ;;  %1829 = vmatprep.subr.bf16.mxu1 %v2787_v25  ;;  %v2079_v25 = vld [vmem:[%s3502_s26 + $0x20] sm:$0xff] }
 0x7ca   : > { %2564 = vmatpush3.bf16.msra.mxu0 %v2774_v60  ;;  %v2814_v60 = vld [vmem:[#allocation15 + $0x78] sm:$0xff]  }
 0x7cb   : > { %2565 = vmatprep.subr.bf16.mxu0 %v3118_v20 }
 0x7ce   : > { %2566 = vmatpush3.bf16.msra.mxu0 %v2775_v62  ;;  %v2815_v62 = vld [vmem:[#allocation15 + $0x38] sm:$0xff]  }
 0x7cf   : > { %2452 = vmatprep.subr.bf16.mxu0 %v2800_v37 }
 0x7d2   : > { %1225 = vrot.lane.b32.xlu1 %v1223_v48, %s3122_s6  ;;  %v2811_v48 = vld [vmem:[#allocation15 + $0x28] sm:$0xff]  }
 0x831   : > { %v1397_v59 = vpop.permute.xlu0 %1396 }
 0x84a   : > { %v1487_v54 = vpop.xlane.xlu1 %1486 }
 0x84e   : > { %v981_v55 = vpop.xlane.xlu1 %980 }
 0x84f   : > { %2828 = vrcp.f32 %v981_v55 }
 0x850   : > { %2830 = vrcp.f32 %v1487_v54  ;;  %v2378_v54 = vld [vmem:[%s3799_s8] ss:$0 sm:$0xff]  ;;  %s2175_s8 = sshll.u32 %s622_s29, 4  ;;  %s3687_s8 = int_to_ptr.vmem [resolvable:$true] %s2175_s8 }
 0x851   : > { %s3018_s6 = scalar_lea.vmem %s3687_s8, 16 }
 0x852   : > { %v1226_v58 = vpop.permute.xlu1 %1225  ;;  %p3019_p2 = scmp.ne.s32.totalorder %s3687_s8, %s3018_s6 }
 0x854   : > { %p3020_p12 = pnand %p3019_p2, %p3805_p10 }
 0x856   : > { %p3021_p3 = pneg %p3020_p12 }
 0x859   : > { %v2829_v56 = vpop.eup %2828 }
 0x85a   : > { %v1056_v57 = vmul.f32 %v2829_v56, %v3590_v61  ;;  %v2831_v63 = vpop.eup %2830 }
 0x85c   : > { %1057 = vst.msk [vmem:[#allocation2] sm:$0xff] %vm895_vm1, %v1056_v57 }
 0x85d   : > { %1229 = vst.msk [vmem:[#allocation2] sm:$0xff] %vm1228_vm3, %v1226_v58  ;;  %v2812_v58 = vld [vmem:[#allocation15 + $0x70] sm:$0xff]  }
 0x85e   : > { %1400 = vst.msk [vmem:[#allocation2] sm:$0xff] %vm1399_vm4, %v1397_v59  ;;  %v2813_v59 = vld [vmem:[#allocation15 + $0x30] sm:$0xff]  }
 0x88f   : > { %v1560_v1 = vpop.f32.mrb[4].mxu1 }
 0x890   : > { %v1565_v2 = vmul.f32 %v2831_v63, %v1560_v1  ;;  %v2550_v3 = vpop.f32.mrb[5].mxu1  ;;  %v1731_v63 = vld [vmem:[%s3800_s15] sm:$0x3] }
 0x891   : > { %v1736_v1 = vrot.slane %v1731_v63, %v665_v30 }
 0x892   : > { %1567 = vrot.lane.b32.xlu1 %v1565_v2, %s3120_s11  ;;  %v1740_v2 = vrot.slane %v1731_v63, %v669_v32  ;;  %s2414_s11 = sshll.u32 %s3243_s21, 4 }
 0x893   : > { %s3692_s4 = scalar_lea.hbm %s3804_s14, %s2414_s11 }
 0x904   : > { %v1568_v61 = vpop.permute.xlu1 %1567 }
 0x905   : > { %1571 = vst.msk [vmem:[#allocation2] sm:$0xff] %vm1570_vm5, %v1568_v61 }
 0x90c   : > { %v1572_v4 = vld [vmem:[#allocation2] sm:$0xff] }
 0x90d   : > { %v1573_v5 = vpack.c.bf16 %v1572_v4, %v1572_v4 }
 0x90f   : > { %2568 = vmatmul.mubr.bf16.vlgmr.msra.gmra.mrb[20].mxu0 %v1573_v5 }
 0x910   : > { %2453 = vmatpush3.bf16.msra.mxu0 %v2801_v38 }
 0x911   : > { %2454 = vmatprep.subr.bf16.mxu0 %v2802_v39 }
 0x914   : > { %2455 = vmatpush3.bf16.msra.mxu0 %v2803_v40  ;;  %v2085_v40 = vld [vmem:[%s3502_s26 + $0x50] sm:$0xff] }
 0x915   : > { %2456 = vmatprep.subr.bf16.mxu0 %v2804_v41  ;;  %v2086_v41 = vld [vmem:[%s3502_s26 + $0x58] sm:$0xff] }
 0x918   : > { %2457 = vmatpush3.bf16.msra.mxu0 %v2805_v42  ;;  %v2622_v42 = vpack.c.bf16 %v2086_v41, %v2085_v40 }
 0x919   : > { %2458 = vmatprep.subr.bf16.mxu0 %v2806_v43  ;;  %v2087_v43 = vld [vmem:[%s3502_s26 + $0x60] sm:$0xff] }
 0x91c   : > { %2459 = vmatpush3.bf16.msra.mxu0 %v2807_v44  ;;  %v2088_v44 = vld [vmem:[%s3502_s26 + $0x68] sm:$0xff] }
 0x91d   : > { %2460 = vmatprep.subr.bf16.mxu0 %v2808_v45  ;;  %v2625_v45 = vpack.c.bf16 %v2088_v44, %v2087_v43 }
 0x920   : > { %2461 = vmatpush3.bf16.msra.mxu0 %v2809_v46  ;;  %v2089_v46 = vld [vmem:[%s3502_s26 + $0x70] sm:$0xff] }
 0x921   : > { %2462 = vmatprep.subr.bf16.mxu0 %v2810_v47  ;;  %v2090_v47 = vld [vmem:[%s3502_s26 + $0x78] sm:$0xff] }
 0x924   : > { %2463 = vmatpush3.bf16.msra.mxu0 %v2811_v48  ;;  %v2628_v48 = vpack.c.bf16 %v2090_v47, %v2089_v46 }
 0x925   : > { %2464 = vmatprep.subr.bf16.mxu0 %v2812_v58 }
 0x928   : > { %2465 = vmatpush3.bf16.msra.mxu0 %v2813_v59 }
 0x929   : > { %2466 = vmatprep.subr.bf16.mxu0 %v2814_v60 }
 0x92c   : > { %2467 = vmatpush3.bf16.msra.mxu0 %v2815_v62 }
 0x9e2   : > { %v1679_v7 = vpop.f32.mrb[20].mxu0 }
 0x9e3   : > { %v1680_v8 = vadd.f32 %v2368_v6, %v1679_v7  ;;  %v2569_v9 = vpop.f32.mrb[21].mxu0 }
 0x9e4   : > { %v1682_v10 = vpop.f32.mrb[22].mxu0 }
 0x9e5   : > { %v2570_v11 = vpop.f32.mrb[23].mxu0  ;;  %v1685_v12 = vadd.f32 %v1680_v8, %v3522_v17  ;;  %v2785_v17 = vld [vmem:[#allocation14 + $0x30] ss:$8 sps:$4 sm:$0xff]  }
 0x9e6   : > { %1830 = vmatpush1.bf16.msra.mxu1 %v2785_v17  ;;  %v2080_v17 = vld [vmem:[%s3502_s26 + $0x28] sm:$0xff] }
 0x9e7   : > { %1688 = vadd.xlane.f32.xlu1 %v1685_v12  ;;  %1831 = vmatprep.subr.bf16.mxu1 %v2790_v26  ;;  %v2613_v26 = vpack.c.bf16 %v2080_v17, %v2079_v25 }
 0x9ea   : > { %1832 = vmatpush1.bf16.msra.mxu1 %v2788_v27  ;;  %v2081_v27 = vld [vmem:[%s3502_s26 + $0x30] sm:$0xff] }
 0x9eb   : > { %1833 = vmatprep.subr.bf16.mxu1 %v2793_v28  ;;  %v2082_v28 = vld [vmem:[%s3502_s26 + $0x38] sm:$0xff] }
 0x9ee   : > { %1834 = vmatpush1.bf16.msra.mxu1 %v2791_v31  ;;  %v2616_v31 = vpack.c.bf16 %v2082_v28, %v2081_v27 }
 0x9ef   : > { %1835 = vmatprep.subr.bf16.mxu1 %v2796_v33  ;;  %v2083_v33 = vld [vmem:[%s3502_s26 + $0x40] sm:$0xff] }
 0x9f2   : > { %1836 = vmatpush1.bf16.msra.mxu1 %v2794_v34  ;;  %v2084_v34 = vld [vmem:[%s3502_s26 + $0x48] sm:$0xff] }
 0x9f3   : > { %1837 = vmatprep.subr.bf16.mxu1 %v2799_v35  ;;  %v2619_v35 = vpack.c.bf16 %v2084_v34, %v2083_v33 }
 0x9f6   : > { %1838 = vmatpush1.bf16.msra.mxu1 %v2797_v36 }
 0x9f7   : > { %2606 = vmatprep.subr.bf16.mxu1 %v3123_v19 }
 0xa74   : > { %v1689_v21 = vpop.xlane.xlu1 %1688 }
 0xa75   : > { %v1691_v22 = vmul.f32 0.0078125, %v1689_v21  ;;  %v2607_v21 = vpack.c.bf16 %v2076_v18, %v2075_v16 }
 0xa77   : > { %v1692_v23 = vsub.f32 %v1685_v12, %v1691_v22  ;;  %v2077_v22 = vld [vmem:[%s3502_s26 + $0x10] sm:$0xff] }
 0xa79   : > { %v1693_v24 = vmul.f32 %v1692_v23, %v1692_v23 }
 0xa7b   : > { %1694 = vadd.xlane.f32.xlu0 %v1693_v24 }
 0xb08   : > { %v1695_v49 = vpop.xlane.xlu0 %1694 }
 0xb09   : > { %v1696_v50 = vmul.f32 0.0078125, %v1695_v49 }
 0xb0b   : > { %v1697_v51 = vadd.f32 1e-05, %v1696_v50 }
 0xb0d   : > { %2832 = vrsqrt.f32 %v1697_v51 }
 0xb17   : > { %v2833_v0 = vpop.eup %2832 }
 0xb18   : > { %v1699_v53 = vmul.f32 %v2833_v0, %v1692_v23  ;;  %v2078_v23 = vld [vmem:[%s3502_s26 + $0x18] sm:$0xff]  ;;  %s2072_s26 = sld [smem:[#allocation5 + %s3243_s21]]  ;;  %s3124_s21 = smov [#allocation17]  }
 0xb19   : > { %v2610_v24 = vpack.c.bf16 %v2078_v23, %v2077_v22  ;;  %s3022_s16 = sshll.u32 %s3124_s21, 4  ;;  %s3023_s16 = int_to_ptr.vmem [resolvable:$false] %s3022_s16 }
 0xb1a   : > { %v1706_v55 = vmul.f32 %v2377_v52, %v1699_v53  ;;  %v2412_v52 = vld [vmem:[%s3802_s25] ss:$0 sm:$0xff]  ;;  %s3024_s25 = scalar_lea.vmem %s3023_s16, 32  ;;  %p3025_p5 = scmp.lt.s32.totalorder %s3687_s8, %s3023_s16 }
 0xb1b   : > { %p3026_p8 = scmp.lt.s32.totalorder %s3024_s25, %s3018_s6 }
 0xb1c   : > { %v1713_v56 = vadd.f32 %v2378_v54, %v1706_v55  ;;  %v2413_v54 = vld [vmem:[%s3803_s22] ss:$0 sm:$0xff] }
 0xb1d   : > { %p3027_p11 = por %p3026_p8, %p3025_p5 }
 0xb1e   : > { %v1714_v57 = vpack.c.bf16 %v1713_v56, %v1713_v56  ;;  %s2073_s24 = scalar_lea.vmem [#allocation3], %s2072_s26 }
 0xb1f   : > { %p3028_p7 = pnand %p3027_p11, %p3021_p3 }
 0xb20   : > { %1856 = vmatmul.mubr.bf16.vlgmr.msra.gmra.mrb[8].mxu1 %v1714_v57 }
 0xb21   : > { %2603 = vmatprep.mubr.msk.f32.mxu1 %vm3119_vm0, %v3118_v20  ;;  %2608 = vmatpush3.bf16.xpose.msra.mxu1 %v2607_v21 }
 0xb22   : > { %2609 = vmatprep.subr.bf16.mxu1 %v3123_v19 }
 0xb29   : > { %2611 = vmatpush3.bf16.xpose.msra.mxu1 %v2610_v24 }
 0xb2a   : > { %2612 = vmatprep.subr.bf16.mxu1 %v3123_v19 }
 0xb31   : > { %2614 = vmatpush3.bf16.xpose.msra.mxu1 %v2613_v26 }
 0xb32   : > { %2615 = vmatprep.subr.bf16.mxu1 %v3123_v19 }
 0xb39   : > { %2617 = vmatpush3.bf16.xpose.msra.mxu1 %v2616_v31 }
 0xb3a   : > { %2618 = vmatprep.subr.bf16.mxu1 %v3123_v19 }
 0xb41   : > { %2620 = vmatpush3.bf16.xpose.msra.mxu1 %v2619_v35 }
 0xb42   : > { %2621 = vmatprep.subr.bf16.mxu1 %v3123_v19 }
 0xb49   : > { %2623 = vmatpush3.bf16.xpose.msra.mxu1 %v2622_v42 }
 0xb4a   : > { %2624 = vmatprep.subr.bf16.mxu1 %v3123_v19 }
 0xb51   : > { %2626 = vmatpush3.bf16.xpose.msra.mxu1 %v2625_v45 }
 0xb52   : > { %2627 = vmatprep.subr.bf16.mxu1 %v3123_v19 }
 0xb59   : > { %2629 = vmatpush3.bf16.xpose.msra.mxu1 %v2628_v48 }
 0xbf3   : > { %v1857_v3 = vpop.f32.mrb[8].mxu1 }
 0xbf4   : > { %v1858_v20 = vadd.f32 %v1857_v3, %v1736_v1  ;;  %v1859_v61 = vpop.f32.mrb[9].mxu1 }
 0xbf5   : > { %v1860_v4 = vadd.f32 %v1859_v61, %v1740_v2  ;;  %v1861_v5 = vpop.f32.mrb[10].mxu1 }
 0xbf6   : > { %v1864_v6 = vmax.f32 %v1858_v20, 0.0  ;;  %v1862_v7 = vpop.f32.mrb[11].mxu1 }
 0xbf7   : > { %v1865_v8 = vmax.f32 %v1860_v4, 0.0 }
 0xbf8   : > { %v1866_v10 = vpack.c.bf16 %v1864_v6, %v1864_v6 }
 0xbf9   : > { %v1867_v9 = vpack.c.bf16 %v1865_v8, %v1865_v8 }
 0xbfb   : > { %2035 = vmatprep.mubr.bf16.mxu0 %v1867_v9 }
 0xbfc   : > { %2036 = vmatmul.mubr.bf16.vlgmr.msra.gmra.mrb[24].mxu0 %v1866_v10 }
 0xccf   : > { %v2468_v11 = vpop.f32.mrb[24].mxu0 }
 0xcd0   : > { %v2469_v30 = vpop.f32.mrb[25].mxu0 }
 0xcd1   : > { %v2470_v32 = vadd.f32 %v2469_v30, %v2468_v11  ;;  %v2471_v12 = vpop.f32.mrb[26].mxu0 }
 0xcd2   : > { %v2472_v13 = vpop.f32.mrb[27].mxu0 }
 0xcd3   : > { %v2038_v14 = vadd.f32 %v2470_v32, %v2395_v29 }
 0xcd5   : > { %v2043_v15 = vadd.f32 %v2038_v14, %v1713_v56 }
 0xcd7   : > { %2046 = vadd.xlane.f32.xlu1 %v2043_v15 }
 0xd64   : > { %v2047_v36 = vpop.xlane.xlu1 %2046 }
 0xd65   : > { %v2048_v37 = vmul.f32 0.0078125, %v2047_v36 }
 0xd67   : > { %v2049_v38 = vsub.f32 %v2043_v15, %v2048_v37 }
 0xd69   : > { %v2050_v39 = vmul.f32 %v2049_v38, %v2049_v38 }
 0xd6b   : > { %2051 = vadd.xlane.f32.xlu1 %v2050_v39 }
 0xdf8   : > { %v2052_v49 = vpop.xlane.xlu1 %2051 }
 0xdf9   : > { %v2053_v50 = vmul.f32 0.0078125, %v2052_v49 }
 0xdfb   : > { %v2054_v51 = vadd.f32 1e-05, %v2053_v50 }
 0xdfd   : > { %2834 = vrsqrt.f32 %v2054_v51 }
 0xe07   : > { %v2835_v0 = vpop.eup %2834 }
 0xe08   : > { %v2056_v53 = vmul.f32 %v2835_v0, %v2049_v38 }
 0xe0a   : > { %v2063_v55 = vmul.f32 %v2412_v52, %v2056_v53 }
 0xe0c   : > { %v2070_v56 = vadd.f32 %v2413_v54, %v2063_v55 }
 0xe0e   : > { %2071 = vst [vmem:[#allocation3] sm:$0xff] %v2070_v56 }
 0xe15   : > { %v2074_v57 = vld [vmem:[%s2073_s24] sm:$0x1] }
 0xe16   : > { %2604 = vmatmul.mubr.f32.vlgmr.msra.gmra.mrb[6].mxu1 %v2074_v57 }
 0xee9   : > { %v2157_v58 = vpop.f32.mrb[6].mxu1 }
 0xeea   : > { %2161 = vst [vmem:[%s622_s29] sm:$0x1] %v2157_v58  ;;  %v2605_v59 = vpop.f32.mrb[7].mxu1 }
 0xeeb   : > { %3031 = shalt.err (!%p3028_p7)
}
 0xeec   : > { %s3032_s13 = scalar_lea.hbm %s3692_s4, 16  ;;  %s3036_s22 = scalar_lea.hbm %s3804_s14, 32 }
 0xeed   : > { %p3033_p6 = scmp.ne.s32.totalorder %s3692_s4, %s3032_s13  ;;  %p3037_p0 = scmp.lt.u32.totalorder %s3692_s4, %s3804_s14 }
 0xeee   : > { %p3038_p1 = scmp.lt.u32.totalorder %s3036_s22, %s3032_s13  ;;  %p3040_p2 = scmp.lt.u32.totalorder %s3032_s13, %s3692_s4 }
 0xeef   : > { %p3034_p13 = pnand %p3033_p6, %p3805_p10 }
 0xef0   : > { %p3039_p9 = por %p3038_p1, %p3037_p0 }
 0xef1   : > { %p3035_p4 = pneg %p3034_p13 }
 0xef2   : > { %p3041_p12 = por %p3040_p2, %p3039_p9 }
 0xef4   : > { %p3042_p3 = pnand %p3041_p12, %p3035_p4 }
 0xef6   : > { %3045 = shalt.err (!%p3042_p3)
}
 0xef7   : > { %2650 = dma.vmem_to_hbm [thread:$0]  (%p3805_p10), %s3687_s8, 16, %s3692_s4, %s2163_s10  }
 0xef8 PF: > { %s2187_s29 = sand.u32 1, %s3090_s0   ;;  %p3806_p5 = scmp.ne.s32.totalorder %s3785_s27, 0 }
 0xef9   : > { %p3807_p8 = scmp.ge.s32.totalorder %s3102_s18, 2  ;;  %s2188_s11 = scalar_lea.sflag [#allocation8], %s2187_s29 }
 0xefb   : > { %p2673_p11 = pnand %p3807_p8, %p3806_p5 }
 0xefd   : > { %3085 = dma.done.wait (!%p2673_p11), %s2188_s11, 16  }
 0xefe   : > { %3087 = vsyncadd (!%p2673_p11), %s2188_s11, 4294967280  ;;  %p38_p7 = scmp.ge.s32.totalorder %s3367_s23, 4   ;;  %s3808_s0 = smov %s3094_s9 }
 0xeff   : > { %s3809_s9 = smov %s3098_s17  ;;  %s3810_s17 = smov %s3378_s19 }
 0xf00   : > { %s3811_s18 = smov %s3367_s23  ;;  %40 = sbr.rel (!%p38_p7) target bundleno = 29 (0x1d), region = 158 }
 0xf07   :  { %2192 = vsyncpa [#allocation7], 1 }
 0xf08   :  { %2194 = vsyncpa [#allocation7 + $0x1], 1 }
 0xf09   :  { %2195 = vsyncpa [#allocation10], 1 }
 0xf0a   :  { %2197 = vsyncpa [#allocation10 + $0x1], 1 }
 0xf0b   :  { %2198 = vsyncpa [#allocation13], 1 }
 0xf0c   :  { %2199 = vsyncpa [#allocation16], 1 }
 0xf0d   :  { %2200 = vsyncpa [#allocation8], 1 }
 0xf0e   :  { %2202 = vsyncpa [#allocation8 + $0x1], 1 }

</bundles_post_ra>
